<compile_context>
chip_gen: v7x
topology: tpu7x:2x2x1
jax: 0.10.0
libtpu: 0.0.40
codegen_flags: <defaults>
</compile_context>

<pallas_src>
import math
import numpy as np

import jax
import jax.numpy as jnp
from jax.experimental import pallas as pl
from jax.experimental.pallas import tpu as pltpu


# ----------------------------------------------------------------------------
# Pallas kernel: one full IDA stage (proj -> upsample -> +skip -> node)
# ----------------------------------------------------------------------------

def _conv3x3_rows_bn_relu(x, pad_ref, w3_ref, scale, bias):
    """3x3 conv (pad=1) + fused BN + ReLU on one image in (H, W*Cin) layout.

    x:       (H, W*Cin)   f32 value
    pad_ref: (H+2, W*Cin) f32 VMEM scratch (height zero-padding)
    w3_ref:  (3, W*Cin, W*Cout) bf16 banded weights, one matrix per kernel row
    scale:   (1, W*Cout)  f32 fused BN scale (tiled over W)
    bias:    (1, W*Cout)  f32 fused BN bias  (tiled over W)
    returns  (H, W*Cout)  f32
    """
    H, Win = x.shape
    zero_row = jnp.zeros((1, Win), jnp.float32)
    pad_ref[pl.ds(0, 1), :] = zero_row
    pad_ref[pl.ds(H + 1, 1), :] = zero_row
    pad_ref[pl.ds(1, H), :] = x

    acc = jnp.dot(pad_ref[pl.ds(0, H), :].astype(jnp.bfloat16), w3_ref[0],
                  preferred_element_type=jnp.float32)
    acc = acc + jnp.dot(pad_ref[pl.ds(1, H), :].astype(jnp.bfloat16), w3_ref[1],
                        preferred_element_type=jnp.float32)
    acc = acc + jnp.dot(pad_ref[pl.ds(2, H), :].astype(jnp.bfloat16), w3_ref[2],
                        preferred_element_type=jnp.float32)
    return jnp.maximum(acc * scale + bias, 0.0)


def _ida_stage_kernel(x_ref, skip_ref,
                      wproj_ref, sproj_ref, bproj_ref,
                      mh_ref, uw_ref,
                      wnode_ref, snode_ref, bnode_ref,
                      o_ref,
                      pad_proj_ref, pad_node_ref):
    # proj: 3x3 conv (zero-offset DCN approx) + BN + ReLU : (Hi, Wi*Ci) -> (Hi, Wi*Co)
    y = _conv3x3_rows_bn_relu(x_ref[0], pad_proj_ref, wproj_ref,
                              sproj_ref[...], bproj_ref[...])
    # depthwise bilinear ConvTranspose2d (separable): rows then columns
    u1 = jnp.dot(mh_ref[...], y.astype(jnp.bfloat16),
                 preferred_element_type=jnp.float32)                 # (Ho, Wi*Co)
    u2 = jnp.dot(u1.astype(jnp.bfloat16), uw_ref[...],
                 preferred_element_type=jnp.float32)                 # (Ho, Wo*Co)
    # residual add with layers[i-1] (f32, in VMEM)
    z = u2 + skip_ref[0]
    # node: 3x3 conv + BN + ReLU : (Ho, Wo*Co) -> (Ho, Wo*Co)
    out = _conv3x3_rows_bn_relu(z, pad_node_ref, wnode_ref,
                                snode_ref[...], bnode_ref[...])
    o_ref[0] = out.astype(o_ref.dtype)


def _run_ida_stage(x_kl, skip_kl, arrs):
    """x_kl: (N, Hi, Wi*Ci) f32; skip_kl: (N, Ho, Wo*Co) f32 -> (N, Ho, Wo*Co) f32."""
    N, Hi, WiCi = x_kl.shape
    _, Ho, WoCo = skip_kl.shape
    WiCo = arrs["wproj"].shape[2]

    return pl.pallas_call(
        _ida_stage_kernel,
        out_shape=jax.ShapeDtypeStruct((N, Ho, WoCo), jnp.float32),
        grid=(N,),
        in_specs=[
            pl.BlockSpec((1, Hi, WiCi), lambda n: (n, 0, 0)),      # x
            pl.BlockSpec((1, Ho, WoCo), lambda n: (n, 0, 0)),      # skip
            pl.BlockSpec((3, WiCi, WiCo), lambda n: (0, 0, 0)),    # proj banded W (bf16)
            pl.BlockSpec((1, WiCo), lambda n: (0, 0)),             # proj BN scale
            pl.BlockSpec((1, WiCo), lambda n: (0, 0)),             # proj BN bias
            pl.BlockSpec((Ho, Hi), lambda n: (0, 0)),              # row upsample matrix
            pl.BlockSpec((WiCo, WoCo), lambda n: (0, 0)),          # col upsample matrix
            pl.BlockSpec((3, WoCo, WoCo), lambda n: (0, 0, 0)),    # node banded W (bf16)
            pl.BlockSpec((1, WoCo), lambda n: (0, 0)),             # node BN scale
            pl.BlockSpec((1, WoCo), lambda n: (0, 0)),             # node BN bias
        ],
        out_specs=pl.BlockSpec((1, Ho, WoCo), lambda n: (n, 0, 0)),
        scratch_shapes=[
            pltpu.VMEM((Hi + 2, WiCi), jnp.float32),               # H-padded proj input
            pltpu.VMEM((Ho + 2, WoCo), jnp.float32),               # H-padded node input
        ],
        compiler_params=pltpu.CompilerParams(
            dimension_semantics=("parallel",),
            vmem_limit_bytes=32 * 1024 * 1024,
        ),
    )(x_kl, skip_kl,
      arrs["wproj"], arrs["sproj"], arrs["bproj"],
      arrs["mh"], arrs["uw"],
      arrs["wnode"], arrs["snode"], arrs["bnode"])


# ----------------------------------------------------------------------------
# Host-side builders (layout conversion, banded conv weights, upsample matrices)
# ----------------------------------------------------------------------------

def _to_kernel_layout(x_nchw):
    N, C, H, W = x_nchw.shape
    return jnp.transpose(x_nchw, (0, 2, 3, 1)).reshape(N, H, W * C)


def _from_kernel_layout(x_kl, C, H, W):
    N = x_kl.shape[0]
    return jnp.transpose(x_kl.reshape(N, H, W, C), (0, 3, 1, 2))


def _banded_conv_w_np(w_oihw, W):
    """(Co, Ci, 3, 3) conv weights -> (3, W*Ci, W*Co) banded matrices.

    B[kh, w'*Ci+ci, w*Co+co] = K[co, ci, kh, w'-w+1] for |w'-w| <= 1, else 0,
    so that  out_row_h = sum_kh  xpadH[h+kh] @ B[kh]  reproduces a 3x3 conv
    with zero padding (the band handles the width padding).
    """
    Co, Ci, _, _ = w_oihw.shape
    B = np.zeros((3, W * Ci, W * Co), dtype=np.float32)
    for kh in range(3):
        for w in range(W):
            for kw in range(3):
                wp = w + kw - 1
                if 0 <= wp < W:
                    B[kh, wp * Ci:(wp + 1) * Ci, w * Co:(w + 1) * Co] = \
                        w_oihw[:, :, kh, kw].T
    return B


def _make_up_matrix_np(f, n_in):
    """1-D matrix of ConvTranspose1d(k=2f, s=f, p=f//2) with fill_up_weights
    bilinear taps; the 2-D depthwise ConvTranspose2d is its separable product."""
    K = 2 * f
    pad = f // 2
    n_out = (n_in - 1) * f - 2 * pad + K
    fc = math.ceil(K / 2)
    c = (2 * fc - 1 - fc % 2) / (2.0 * fc)
    w1d = np.array([1 - abs(i / fc - c) for i in range(K)], dtype=np.float32)
    M = np.zeros((n_out, n_in), dtype=np.float32)
    for h in range(n_in):
        for k in range(K):
            o_idx = h * f - pad + k
            if 0 <= o_idx < n_out:
                M[o_idx, h] += w1d[k]
    return M


def _init_deform_conv(key, chi, cho):
    """Deterministic synthetic params for DeformConv(chi, cho) = DCN3x3 + BN + ReLU."""
    k_w, k_b, k_g, k_be, k_m, k_v = jax.random.split(key, 6)
    w = 0.1 * jax.random.normal(k_w, (cho, chi, 3, 3), jnp.float32)   # OIHW
    conv_b = 0.05 * jax.random.normal(k_b, (cho,), jnp.float32)
    gamma = 1.0 + 0.1 * jax.random.normal(k_g, (cho,), jnp.float32)
    beta = 0.1 * jax.random.normal(k_be, (cho,), jnp.float32)
    run_mean = 0.1 * jax.random.normal(k_m, (cho,), jnp.float32)
    run_var = 1.0 + 0.1 * jax.random.uniform(k_v, (cho,), jnp.float32)
    eps = 1e-5
    bn_scale = gamma / jnp.sqrt(run_var + eps)
    return {
        "w": np.asarray(w, np.float32),
        "scale": np.asarray(bn_scale, np.float32),
        "bias": np.asarray((conv_b - run_mean) * bn_scale + beta, np.float32),
    }


# ----------------------------------------------------------------------------
# IDAUp module
# ----------------------------------------------------------------------------

class IDAUpPallas:
    def __init__(self, o, channels, up_f, key):
        self.o = o
        self.channels = list(channels)
        self.up_f = list(up_f)
        self.params = {}
        for i in range(1, len(channels)):
            key, k1, k2 = jax.random.split(key, 3)
            self.params[f"proj_{i}"] = _init_deform_conv(k1, channels[i], o)
            self.params[f"node_{i}"] = _init_deform_conv(k2, o, o)
        self._stage_cache = {}

    def _stage_arrays(self, j, Hi, Wi):
        cache_key = (j, Hi, Wi)
        if cache_key in self._stage_cache:
            return self._stage_cache[cache_key]
        o = self.o
        f = int(self.up_f[j])
        proj = self.params[f"proj_{j}"]
        node = self.params[f"node_{j}"]
        Mh = _make_up_matrix_np(f, Hi)
        Mw = _make_up_matrix_np(f, Wi)
        Ho, Wo = Mh.shape[0], Mw.shape[0]
        arrs = {
            "wproj": jnp.asarray(_banded_conv_w_np(proj["w"], Wi), jnp.bfloat16),
            "sproj": jnp.asarray(np.tile(proj["scale"], Wi)[None, :], jnp.float32),
            "bproj": jnp.asarray(np.tile(proj["bias"], Wi)[None, :], jnp.float32),
            "mh": jnp.asarray(Mh, jnp.bfloat16),
            "uw": jnp.asarray(np.kron(Mw.T, np.eye(o, dtype=np.float32)), jnp.bfloat16),
            "wnode": jnp.asarray(_banded_conv_w_np(node["w"], Wo), jnp.bfloat16),
            "snode": jnp.asarray(np.tile(node["scale"], Wo)[None, :], jnp.float32),
            "bnode": jnp.asarray(np.tile(node["bias"], Wo)[None, :], jnp.float32),
            "Ho": Ho,
            "Wo": Wo,
        }
        self._stage_cache[cache_key] = arrs
        return arrs

    def __call__(self, layers_nchw, startp, endp):
        """layers_nchw: list of NCHW arrays. Returns a new list (NCHW)."""
        out_nchw = list(layers_nchw)
        kl, meta = {}, {}
        for idx in range(startp, endp):
            N, C, H, W = layers_nchw[idx].shape
            meta[idx] = (C, H, W)
            kl[idx] = _to_kernel_layout(layers_nchw[idx])
        for i in range(startp + 1, endp):
            j = i - startp
            Ci, Hi, Wi = meta[i]
            arrs = self._stage_arrays(j, Hi, Wi)
            Ho, Wo = arrs["Ho"], arrs["Wo"]
            assert meta[i - 1] == (self.o, Ho, Wo), "skip/upsample shape mismatch"
            kl[i] = _run_ida_stage(kl[i], kl[i - 1], arrs)
            meta[i] = (self.o, Ho, Wo)
            out_nchw[i] = _from_kernel_layout(kl[i], self.o, Ho, Wo)
        return out_nchw


# ----------------------------------------------------------------------------
# Pure-JAX reference (same bf16-rounded conv weights) for a sanity check
# ----------------------------------------------------------------------------

def _reference_forward(layers_nchw, startp, endp, ida):
    def conv_bn_relu(x, p):
        w = jnp.asarray(p["w"]).astype(jnp.bfloat16).astype(jnp.float32)
        y = jax.lax.conv_general_dilated(
            x, w, window_strides=(1, 1), padding=((1, 1), (1, 1)),
            dimension_numbers=("NCHW", "OIHW", "NCHW"))
        s = jnp.asarray(p["scale"])[None, :, None, None]
        b = jnp.asarray(p["bias"])[None, :, None, None]
        return jnp.maximum(y * s + b, 0.0)

    outs = list(layers_nchw)
    for i in range(startp + 1, endp):
        j = i - startp
        f = int(ida.up_f[j])
        y = conv_bn_relu(outs[i], ida.params[f"proj_{j}"])
        Hi, Wi = y.shape[2], y.shape[3]
        Mh = jnp.asarray(_make_up_matrix_np(f, Hi))
        Mw = jnp.asarray(_make_up_matrix_np(f, Wi))
        up = jnp.einsum("oh,nchw->ncow", Mh, y)
        up = jnp.einsum("pw,ncow->ncop", Mw, up)
        outs[i] = conv_bn_relu(up + outs[i - 1], ida.params[f"node_{j}"])
    return outs


# ----------------------------------------------------------------------------
# Demo
# ----------------------------------------------------------------------------

if __name__ == "__main__":
    key = jax.random.PRNGKey(0)
    o = 16
    channels = [16, 32, 64]
    up_f = [1, 2, 4]
    N = 2
    base = 16

    key, kp = jax.random.split(key)
    layers_nchw = []
    for idx, c in enumerate(channels):
        key, sub = jax.random.split(key)
        s = base // (2 ** idx)
        layers_nchw.append(jax.random.normal(sub, (N, c, s, s), jnp.float32))

    ida = IDAUpPallas(o, channels, up_f, kp)
    out_layers = ida(layers_nchw, 0, len(channels))
    for t in out_layers:
        jax.block_until_ready(t)

    assert out_layers[1].shape == (N, o, base, base)
    assert out_layers[2].shape == (N, o, base, base)

    # numerical sanity check vs. pure-JAX reference (bf16 activation rounding only)
    ref_layers = _reference_forward(layers_nchw, 0, len(channels), ida)
    for i in range(1, len(channels)):
        np.testing.assert_allclose(np.asarray(out_layers[i]),
                                   np.asarray(ref_layers[i]),
                                   rtol=0.05, atol=0.1)

    print("KERNEL_OK")
</pallas_src>

<mosaic_0001>
module attributes {stable_mosaic.version = 11 : i64} {
  func.func @_ida_stage_kernel(%arg0: i32, %arg1: memref<1x8x256xf32, #tpu.memory_space<vmem>>, %arg2: memref<1x16x256xf32, #tpu.memory_space<vmem>>, %arg3: memref<3x256x128xbf16, #tpu.memory_space<vmem>>, %arg4: memref<1x128xf32, #tpu.memory_space<vmem>>, %arg5: memref<1x128xf32, #tpu.memory_space<vmem>>, %arg6: memref<16x8xbf16, #tpu.memory_space<vmem>>, %arg7: memref<128x256xbf16, #tpu.memory_space<vmem>>, %arg8: memref<3x256x256xbf16, #tpu.memory_space<vmem>>, %arg9: memref<1x256xf32, #tpu.memory_space<vmem>>, %arg10: memref<1x256xf32, #tpu.memory_space<vmem>>, %arg11: memref<1x16x256xf32, #tpu.memory_space<vmem>>, %arg12: memref<10x256xf32, #tpu.memory_space<vmem>>, %arg13: memref<18x256xf32, #tpu.memory_space<vmem>>) attributes {dimension_semantics = [#tpu.dimension_semantics<parallel>], iteration_bounds = array<i64: 2>, scalar_prefetch = 0 : i64, scratch_operands = 2 : i64, tpu.core_type = #tpu.core_type<tc>, window_params = [{transform_indices = @transform_0, window_bounds = array<i64: 1, 8, 256>}, {transform_indices = @transform_1, window_bounds = array<i64: 1, 16, 256>}, {pipeline_mode = #tpu.pipeline_mode<synchronous>, transform_indices = @transform_2, window_bounds = array<i64: 3, 256, 128>}, {pipeline_mode = #tpu.pipeline_mode<synchronous>, transform_indices = @transform_3, window_bounds = array<i64: 1, 128>}, {pipeline_mode = #tpu.pipeline_mode<synchronous>, transform_indices = @transform_4, window_bounds = array<i64: 1, 128>}, {pipeline_mode = #tpu.pipeline_mode<synchronous>, transform_indices = @transform_5, window_bounds = array<i64: 16, 8>}, {pipeline_mode = #tpu.pipeline_mode<synchronous>, transform_indices = @transform_6, window_bounds = array<i64: 128, 256>}, {pipeline_mode = #tpu.pipeline_mode<synchronous>, transform_indices = @transform_7, window_bounds = array<i64: 3, 256, 256>}, {pipeline_mode = #tpu.pipeline_mode<synchronous>, transform_indices = @transform_8, window_bounds = array<i64: 1, 256>}, {pipeline_mode = #tpu.pipeline_mode<synchronous>, transform_indices = @transform_9, window_bounds = array<i64: 1, 256>}, {transform_indices = @transform_10, window_bounds = array<i64: 1, 16, 256>}]} {
    %c0 = arith.constant 0 : index
    %c0_0 = arith.constant 0 : index
    %c0_1 = arith.constant 0 : index
    %0 = vector.load %arg1[%c0, %c0_0, %c0_1] : memref<1x8x256xf32, #tpu.memory_space<vmem>>, vector<1x8x256xf32>
    %1 = vector.shape_cast %0 : vector<1x8x256xf32> to vector<8x256xf32>
    %c0_2 = arith.constant 0 : index
    %c0_3 = arith.constant 0 : index
    %2 = vector.load %arg4[%c0_2, %c0_3] : memref<1x128xf32, #tpu.memory_space<vmem>>, vector<1x128xf32>
    %c0_4 = arith.constant 0 : index
    %c0_5 = arith.constant 0 : index
    %3 = vector.load %arg5[%c0_4, %c0_5] : memref<1x128xf32, #tpu.memory_space<vmem>>, vector<1x128xf32>
    %cst = arith.constant 0.000000e+00 : f32
    %4 = vector.broadcast %cst : f32 to vector<1x256xf32>
    %c0_6 = arith.constant 0 : index
    %c0_7 = arith.constant 0 : index
    %5 = vector.load %arg12[%c0_6, %c0_7] : memref<10x256xf32, #tpu.memory_space<vmem>>, vector<1x256xf32>
    tpu.vector_store %arg12[%c0_6, %c0_7], %4 {strides = array<i32>} : memref<10x256xf32, #tpu.memory_space<vmem>>, vector<1x256xf32>,
    %c9 = arith.constant 9 : index
    %c0_8 = arith.constant 0 : index
    %6 = vector.load %arg12[%c9, %c0_8] : memref<10x256xf32, #tpu.memory_space<vmem>>, vector<1x256xf32>
    tpu.vector_store %arg12[%c9, %c0_8], %4 {strides = array<i32>} : memref<10x256xf32, #tpu.memory_space<vmem>>, vector<1x256xf32>,
    %c1 = arith.constant 1 : index
    %c0_9 = arith.constant 0 : index
    %7 = vector.load %arg12[%c1, %c0_9] : memref<10x256xf32, #tpu.memory_space<vmem>>, vector<8x256xf32>
    tpu.vector_store %arg12[%c1, %c0_9], %1 {strides = array<i32>} : memref<10x256xf32, #tpu.memory_space<vmem>>, vector<8x256xf32>,
    %c0_10 = arith.constant 0 : index
    %c0_11 = arith.constant 0 : index
    %8 = vector.load %arg12[%c0_10, %c0_11] : memref<10x256xf32, #tpu.memory_space<vmem>>, vector<8x256xf32>
    %9 = arith.truncf %8 : vector<8x256xf32> to vector<8x256xbf16>
    %c0_12 = arith.constant 0 : index
    %c0_13 = arith.constant 0 : index
    %c0_14 = arith.constant 0 : index
    %10 = vector.load %arg3[%c0_12, %c0_13, %c0_14] : memref<3x256x128xbf16, #tpu.memory_space<vmem>>, vector<1x256x128xbf16>
    %11 = vector.shape_cast %10 : vector<1x256x128xbf16> to vector<256x128xbf16>
    %cst_15 = arith.constant dense<0.000000e+00> : vector<8x128xf32>
    %12 = tpu.matmul %9, %11, %cst_15 {dimension_numbers = #tpu.dot_dimension_numbers<[1], [0], [0], [1], [0, 0, 1, 1], [], []>} : vector<8x256xbf16>, vector<256x128xbf16>, vector<8x128xf32> -> vector<8x128xf32>
    %c1_16 = arith.constant 1 : index
    %c0_17 = arith.constant 0 : index
    %13 = vector.load %arg12[%c1_16, %c0_17] : memref<10x256xf32, #tpu.memory_space<vmem>>, vector<8x256xf32>
    %14 = arith.truncf %13 : vector<8x256xf32> to vector<8x256xbf16>
    %c1_18 = arith.constant 1 : index
    %c0_19 = arith.constant 0 : index
    %c0_20 = arith.constant 0 : index
    %15 = vector.load %arg3[%c1_18, %c0_19, %c0_20] : memref<3x256x128xbf16, #tpu.memory_space<vmem>>, vector<1x256x128xbf16>
    %16 = vector.shape_cast %15 : vector<1x256x128xbf16> to vector<256x128xbf16>
    %cst_21 = arith.constant dense<0.000000e+00> : vector<8x128xf32>
    %17 = tpu.matmul %14, %16, %cst_21 {dimension_numbers = #tpu.dot_dimension_numbers<[1], [0], [0], [1], [0, 0, 1, 1], [], []>} : vector<8x256xbf16>, vector<256x128xbf16>, vector<8x128xf32> -> vector<8x128xf32>
    %18 = arith.addf %12, %17 : vector<8x128xf32>
    %c2 = arith.constant 2 : index
    %c0_22 = arith.constant 0 : index
    %19 = vector.load %arg12[%c2, %c0_22] : memref<10x256xf32, #tpu.memory_space<vmem>>, vector<8x256xf32>
    %20 = arith.truncf %19 : vector<8x256xf32> to vector<8x256xbf16>
    %c2_23 = arith.constant 2 : index
    %c0_24 = arith.constant 0 : index
    %c0_25 = arith.constant 0 : index
    %21 = vector.load %arg3[%c2_23, %c0_24, %c0_25] : memref<3x256x128xbf16, #tpu.memory_space<vmem>>, vector<1x256x128xbf16>
    %22 = vector.shape_cast %21 : vector<1x256x128xbf16> to vector<256x128xbf16>
    %cst_26 = arith.constant dense<0.000000e+00> : vector<8x128xf32>
    %23 = tpu.matmul %20, %22, %cst_26 {dimension_numbers = #tpu.dot_dimension_numbers<[1], [0], [0], [1], [0, 0, 1, 1], [], []>} : vector<8x256xbf16>, vector<256x128xbf16>, vector<8x128xf32> -> vector<8x128xf32>
    %24 = arith.addf %18, %23 : vector<8x128xf32>
    %25 = vector.broadcast %2 : vector<1x128xf32> to vector<8x128xf32>
    %26 = arith.mulf %24, %25 : vector<8x128xf32>
    %27 = vector.broadcast %3 : vector<1x128xf32> to vector<8x128xf32>
    %28 = arith.addf %26, %27 : vector<8x128xf32>
    %cst_27 = arith.constant 0.000000e+00 : f32
    %29 = vector.broadcast %cst_27 : f32 to vector<8x128xf32>
    %30 = arith.maximumf %28, %29 : vector<8x128xf32>
    %c0_28 = arith.constant 0 : index
    %c0_29 = arith.constant 0 : index
    %31 = vector.load %arg6[%c0_28, %c0_29] : memref<16x8xbf16, #tpu.memory_space<vmem>>, vector<16x8xbf16>
    %32 = arith.truncf %30 : vector<8x128xf32> to vector<8x128xbf16>
    %cst_30 = arith.constant dense<0.000000e+00> : vector<16x128xf32>
    %33 = tpu.matmul %31, %32, %cst_30 {dimension_numbers = #tpu.dot_dimension_numbers<[1], [0], [0], [1], [0, 0, 1, 1], [], []>} : vector<16x8xbf16>, vector<8x128xbf16>, vector<16x128xf32> -> vector<16x128xf32>
    %34 = arith.truncf %33 : vector<16x128xf32> to vector<16x128xbf16>
    %c0_31 = arith.constant 0 : index
    %c0_32 = arith.constant 0 : index
    %35 = vector.load %arg7[%c0_31, %c0_32] : memref<128x256xbf16, #tpu.memory_space<vmem>>, vector<128x256xbf16>
    %cst_33 = arith.constant dense<0.000000e+00> : vector<16x256xf32>
    %36 = tpu.matmul %34, %35, %cst_33 {dimension_numbers = #tpu.dot_dimension_numbers<[1], [0], [0], [1], [0, 0, 1, 1], [], []>} : vector<16x128xbf16>, vector<128x256xbf16>, vector<16x256xf32> -> vector<16x256xf32>
    %c0_34 = arith.constant 0 : index
    %c0_35 = arith.constant 0 : index
    %c0_36 = arith.constant 0 : index
    %37 = vector.load %arg2[%c0_34, %c0_35, %c0_36] : memref<1x16x256xf32, #tpu.memory_space<vmem>>, vector<1x16x256xf32>
    %38 = vector.shape_cast %37 : vector<1x16x256xf32> to vector<16x256xf32>
    %39 = arith.addf %36, %38 : vector<16x256xf32>
    %c0_37 = arith.constant 0 : index
    %c0_38 = arith.constant 0 : index
    %40 = vector.load %arg9[%c0_37, %c0_38] : memref<1x256xf32, #tpu.memory_space<vmem>>, vector<1x256xf32>
    %c0_39 = arith.constant 0 : index
    %c0_40 = arith.constant 0 : index
    %41 = vector.load %arg10[%c0_39, %c0_40] : memref<1x256xf32, #tpu.memory_space<vmem>>, vector<1x256xf32>
    %cst_41 = arith.constant 0.000000e+00 : f32
    %42 = vector.broadcast %cst_41 : f32 to vector<1x256xf32>
    %c0_42 = arith.constant 0 : index
    %c0_43 = arith.constant 0 : index
    %43 = vector.load %arg13[%c0_42, %c0_43] : memref<18x256xf32, #tpu.memory_space<vmem>>, vector<1x256xf32>
    tpu.vector_store %arg13[%c0_42, %c0_43], %42 {strides = array<i32>} : memref<18x256xf32, #tpu.memory_space<vmem>>, vector<1x256xf32>,
    %c17 = arith.constant 17 : index
    %c0_44 = arith.constant 0 : index
    %44 = vector.load %arg13[%c17, %c0_44] : memref<18x256xf32, #tpu.memory_space<vmem>>, vector<1x256xf32>
    tpu.vector_store %arg13[%c17, %c0_44], %42 {strides = array<i32>} : memref<18x256xf32, #tpu.memory_space<vmem>>, vector<1x256xf32>,
    %c1_45 = arith.constant 1 : index
    %c0_46 = arith.constant 0 : index
    %45 = vector.load %arg13[%c1_45, %c0_46] : memref<18x256xf32, #tpu.memory_space<vmem>>, vector<16x256xf32>
    tpu.vector_store %arg13[%c1_45, %c0_46], %39 {strides = array<i32>} : memref<18x256xf32, #tpu.memory_space<vmem>>, vector<16x256xf32>,
    %c0_47 = arith.constant 0 : index
    %c0_48 = arith.constant 0 : index
    %46 = vector.load %arg13[%c0_47, %c0_48] : memref<18x256xf32, #tpu.memory_space<vmem>>, vector<16x256xf32>
    %47 = arith.truncf %46 : vector<16x256xf32> to vector<16x256xbf16>
    %c0_49 = arith.constant 0 : index
    %c0_50 = arith.constant 0 : index
    %c0_51 = arith.constant 0 : index
    %48 = vector.load %arg8[%c0_49, %c0_50, %c0_51] : memref<3x256x256xbf16, #tpu.memory_space<vmem>>, vector<1x256x256xbf16>
    %49 = vector.shape_cast %48 : vector<1x256x256xbf16> to vector<256x256xbf16>
    %cst_52 = arith.constant dense<0.000000e+00> : vector<16x256xf32>
    %50 = tpu.matmul %47, %49, %cst_52 {dimension_numbers = #tpu.dot_dimension_numbers<[1], [0], [0], [1], [0, 0, 1, 1], [], []>} : vector<16x256xbf16>, vector<256x256xbf16>, vector<16x256xf32> -> vector<16x256xf32>
    %c1_53 = arith.constant 1 : index
    %c0_54 = arith.constant 0 : index
    %51 = vector.load %arg13[%c1_53, %c0_54] : memref<18x256xf32, #tpu.memory_space<vmem>>, vector<16x256xf32>
    %52 = arith.truncf %51 : vector<16x256xf32> to vector<16x256xbf16>
    %c1_55 = arith.constant 1 : index
    %c0_56 = arith.constant 0 : index
    %c0_57 = arith.constant 0 : index
    %53 = vector.load %arg8[%c1_55, %c0_56, %c0_57] : memref<3x256x256xbf16, #tpu.memory_space<vmem>>, vector<1x256x256xbf16>
    %54 = vector.shape_cast %53 : vector<1x256x256xbf16> to vector<256x256xbf16>
    %cst_58 = arith.constant dense<0.000000e+00> : vector<16x256xf32>
    %55 = tpu.matmul %52, %54, %cst_58 {dimension_numbers = #tpu.dot_dimension_numbers<[1], [0], [0], [1], [0, 0, 1, 1], [], []>} : vector<16x256xbf16>, vector<256x256xbf16>, vector<16x256xf32> -> vector<16x256xf32>
    %56 = arith.addf %50, %55 : vector<16x256xf32>
    %c2_59 = arith.constant 2 : index
    %c0_60 = arith.constant 0 : index
    %57 = vector.load %arg13[%c2_59, %c0_60] : memref<18x256xf32, #tpu.memory_space<vmem>>, vector<16x256xf32>
    %58 = arith.truncf %57 : vector<16x256xf32> to vector<16x256xbf16>
    %c2_61 = arith.constant 2 : index
    %c0_62 = arith.constant 0 : index
    %c0_63 = arith.constant 0 : index
    %59 = vector.load %arg8[%c2_61, %c0_62, %c0_63] : memref<3x256x256xbf16, #tpu.memory_space<vmem>>, vector<1x256x256xbf16>
    %60 = vector.shape_cast %59 : vector<1x256x256xbf16> to vector<256x256xbf16>
    %cst_64 = arith.constant dense<0.000000e+00> : vector<16x256xf32>
    %61 = tpu.matmul %58, %60, %cst_64 {dimension_numbers = #tpu.dot_dimension_numbers<[1], [0], [0], [1], [0, 0, 1, 1], [], []>} : vector<16x256xbf16>, vector<256x256xbf16>, vector<16x256xf32> -> vector<16x256xf32>
    %62 = arith.addf %56, %61 : vector<16x256xf32>
    %63 = vector.broadcast %40 : vector<1x256xf32> to vector<16x256xf32>
    %64 = arith.mulf %62, %63 : vector<16x256xf32>
    %65 = vector.broadcast %41 : vector<1x256xf32> to vector<16x256xf32>
    %66 = arith.addf %64, %65 : vector<16x256xf32>
    %cst_65 = arith.constant 0.000000e+00 : f32
    %67 = vector.broadcast %cst_65 : f32 to vector<16x256xf32>
    %68 = arith.maximumf %66, %67 : vector<16x256xf32>
    %c0_66 = arith.constant 0 : index
    %c0_67 = arith.constant 0 : index
    %c0_68 = arith.constant 0 : index
    %69 = vector.load %arg11[%c0_66, %c0_67, %c0_68] : memref<1x16x256xf32, #tpu.memory_space<vmem>>, vector<1x16x256xf32>
    %70 = vector.shape_cast %69 : vector<1x16x256xf32> to vector<16x256xf32>
    %71 = vector.shape_cast %68 : vector<16x256xf32> to vector<1x16x256xf32>
    tpu.vector_store %arg11[%c0_66, %c0_67, %c0_68], %71 {strides = array<i32>} : memref<1x16x256xf32, #tpu.memory_space<vmem>>, vector<1x16x256xf32>,
    return
  }
  func.func @transform_0(%arg0: i32) -> (i32, i32, i32) {
    %c0_i32 = arith.constant 0 : i32
    %c0_i32_0 = arith.constant 0 : i32
    %c0_i32_1 = arith.constant 0 : i32
    return %arg0, %c0_i32, %c0_i32_0 : i32, i32, i32
  }
  func.func @transform_1(%arg0: i32) -> (i32, i32, i32) {
    %c0_i32 = arith.constant 0 : i32
    %c0_i32_0 = arith.constant 0 : i32
    %c0_i32_1 = arith.constant 0 : i32
    return %arg0, %c0_i32, %c0_i32_0 : i32, i32, i32
  }
  func.func @transform_2(%arg0: i32) -> (i32, i32, i32) {
    %c0_i32 = arith.constant 0 : i32
    %c0_i32_0 = arith.constant 0 : i32
    %c0_i32_1 = arith.constant 0 : i32
    %c0_i32_2 = arith.constant 0 : i32
    return %c0_i32, %c0_i32_0, %c0_i32_1 : i32, i32, i32
  }
  func.func @transform_3(%arg0: i32) -> (i32, i32) {
    %c0_i32 = arith.constant 0 : i32
    %c0_i32_0 = arith.constant 0 : i32
    %c0_i32_1 = arith.constant 0 : i32
    return %c0_i32, %c0_i32_0 : i32, i32
  }
  func.func @transform_4(%arg0: i32) -> (i32, i32) {
    %c0_i32 = arith.constant 0 : i32
    %c0_i32_0 = arith.constant 0 : i32
    %c0_i32_1 = arith.constant 0 : i32
    return %c0_i32, %c0_i32_0 : i32, i32
  }
  func.func @transform_5(%arg0: i32) -> (i32, i32) {
    %c0_i32 = arith.constant 0 : i32
    %c0_i32_0 = arith.constant 0 : i32
    %c0_i32_1 = arith.constant 0 : i32
    return %c0_i32, %c0_i32_0 : i32, i32
  }
  func.func @transform_6(%arg0: i32) -> (i32, i32) {
    %c0_i32 = arith.constant 0 : i32
    %c0_i32_0 = arith.constant 0 : i32
    %c0_i32_1 = arith.constant 0 : i32
    return %c0_i32, %c0_i32_0 : i32, i32
  }
  func.func @transform_7(%arg0: i32) -> (i32, i32, i32) {
    %c0_i32 = arith.constant 0 : i32
    %c0_i32_0 = arith.constant 0 : i32
    %c0_i32_1 = arith.constant 0 : i32
    %c0_i32_2 = arith.constant 0 : i32
    return %c0_i32, %c0_i32_0, %c0_i32_1 : i32, i32, i32
  }
  func.func @transform_8(%arg0: i32) -> (i32, i32) {
    %c0_i32 = arith.constant 0 : i32
    %c0_i32_0 = arith.constant 0 : i32
    %c0_i32_1 = arith.constant 0 : i32
    return %c0_i32, %c0_i32_0 : i32, i32
  }
  func.func @transform_9(%arg0: i32) -> (i32, i32) {
    %c0_i32 = arith.constant 0 : i32
    %c0_i32_0 = arith.constant 0 : i32
    %c0_i32_1 = arith.constant 0 : i32
    return %c0_i32, %c0_i32_0 : i32, i32
  }
  func.func @transform_10(%arg0: i32) -> (i32, i32, i32) {
    %c0_i32 = arith.constant 0 : i32
    %c0_i32_0 = arith.constant 0 : i32
    %c0_i32_1 = arith.constant 0 : i32
    return %arg0, %c0_i32, %c0_i32_0 : i32, i32, i32
  }
}

</mosaic_0001>

<bundles_post_ra>
// kernel: tpu_custom_call.1
= control target key start
LH: loop header
LB: loop body
LE: loop exit
PB: predicated region body
PF: predicated region fallthrough
CT: control target
= control target key end

     0   :  { %s3449_s0 = inlined_call_operand.hbm [shape: f32[2,8,256], index: 0, kind: input, shape index: {}]   ;;  %s3450_s1 = inlined_call_operand.hbm [shape: f32[2,16,256], index: 1, kind: input, shape index: {}]   ;;  %s3451_s2 = inlined_call_operand.hbm [shape: bf16[3,256,128], index: 2, kind: input, shape index: {}]   ;;  %s3452_s3 = inlined_call_operand.vmem [shape: f32[1,128], index: 3, kind: input, shape index: {}]   ;;  %s3453_s4 = inlined_call_operand.vmem [shape: f32[1,128], index: 4, kind: input, shape index: {}]   ;;  %s3454_s5 = inlined_call_operand.vmem [shape: bf16[16,8], index: 5, kind: input, shape index: {}]   ;;  %s3455_s6 = inlined_call_operand.hbm [shape: bf16[128,256], index: 6, kind: input, shape index: {}]   ;;  %s3456_s7 = inlined_call_operand.hbm [shape: bf16[3,256,256], index: 7, kind: input, shape index: {}]   ;;  %s3457_s8 = inlined_call_operand.vmem [shape: f32[1,256], index: 8, kind: input, shape index: {}]   ;;  %s3458_s9 = inlined_call_operand.vmem [shape: f32[1,256], index: 9, kind: input, shape index: {}]   ;;  %s3459_s10 = inlined_call_operand.hbm [shape: f32[2,16,256], index: 10, kind: output, shape index: {}]  }
   0x1   :  { %3466 = sst [smem:[#allocation21_spill]] %s3449_s0 }
   0x2   :  { %3467 = sst [smem:[#allocation22_spill]] %s3451_s2 }
   0x3   :  { %3468 = sst [smem:[#allocation23_spill]] %s3458_s9 }
   0x4   :  { %3469 = sst [smem:[#allocation24_spill]] %s3459_s10 }
   0x5   :  { %15 = vsyncpa [#allocation5], 0 }
   0x6   :  { %17 = vsyncpa [#allocation5 + $0x1], 0 }
   0x7   :  { %18 = vsyncpa [#allocation8], 0 }
   0x8   :  { %20 = vsyncpa [#allocation8 + $0x1], 0 }
   0x9   :  { %21 = vsyncpa [#allocation11], 0 }
   0xa   :  { %22 = vsyncpa [#allocation6], 0 }
   0xb   :  { %24 = vsyncpa [#allocation6 + $0x1], 0  ;;  %s3102_s13 = smov 0   ;;  %s3104_s14 = smov 0  }
   0xc   :  { %s3106_s15 = smov 0   ;;  %s3108_s16 = smov 0  }
   0xd LB: > { %3470 = sst [smem:[#allocation19_spill]] %s3016_s13  ;;  %s3123_s17 = sadd.s32 4294967295, %s3028_s16   ;;  %s3028_s16 = sphi %s3108_s16, %s3497_s16   ;;  %s3024_s15 = sphi %s3106_s15, %s3496_s15   ;;  %s3020_s14 = sphi %s3104_s14, %s3495_s14   ;;  %s3016_s13 = sphi %s3102_s13, %s3494_s13  }
   0xe   : > { %s2223_s18 = sadd.s32 4294967294, %s3028_s16   ;;  %p50_p0 = scmp.ne.s32.totalorder %s3020_s14, %s3016_s13 }
   0xf   : > { %p3460_p1 = scmp.eq.s32.totalorder %s3123_s17, 0  ;;  %p274_p3 = scmp.eq.s32.totalorder %s2223_s18, 1 }
  0x10   : > { %p2224_p5 = scmp.ge.s32.totalorder %s3028_s16, 1  ;;  %p281_p7 = scmp.lt.s32.totalorder %s3028_s16, 3 }
  0x11   : > { %p3132_p4 = por %p3460_p1, %p50_p0  ;;  %p3137_p6 = por %p274_p3, %p50_p0 }
  0x12   : > { %p3142_p8 = pnand %p2224_p5, %p281_p7  ;;  %s3030_s22 = smov [#allocation9]  }
  0x13   : > { %s3471_s19 = scalar_select %p3132_p4, 1, 0 }
  0x14   : > { %s3472_s20 = scalar_select %p3137_p6, 1, 0 }
  0x15   : > { %s3474_s21 = scalar_select %p3142_p8, 1, 0 }
  0x16   : > { %3473 = sst [smem:[#allocation20_spill]] %s3472_s20  ;;  %s293_s23 = sshll.u32 %s3030_s22, 4  ;;  %s3146_s23 = int_to_ptr.vmem [resolvable:$true] %s293_s23 }
  0x17   : > { %p2514_p9 = pneg %p3142_p8  ;;  %s3031_s25 = smov [#allocation10]  }
  0x18   : > { %s315_s26 = sshll.u32 %s3031_s25, 4  ;;  %s3476_s2 = sld [smem:[#allocation22_spill]]  ;;  %s3157_s26 = int_to_ptr.vmem [resolvable:$true] %s315_s26 }
  0x19   : > { %p3153_p11 = pnand %p2514_p9, %p3460_p1 }
  0x1b   : > { %p3167_p13 = pneg %p3153_p11 }
  0x1e   : > { %s2806_s29 = scalar_lea.hbm %s3476_s2, 6144 }
  0x1f   : > { %p2807_p12 = scmp.ne.s32.totalorder %s3476_s2, %s2806_s29  ;;  %p2813_p5 = scmp.lt.u32.totalorder %s2806_s29, %s3476_s2 }
  0x21   : > { %p2809_p0 = pnand %p3167_p13, %p2807_p12 }
  0x23   : > { %p2810_p3 = pneg %p2809_p0 }
  0x25   : > { %p2815_p7 = pnand %p2813_p5, %p2810_p3 }
  0x27   : > { %2818 = shalt.err (!%p2815_p7)
}
  0x28   : > { %s2819_s25 = scalar_lea.vmem %s3146_s23, 6144  ;;  %p2827_p2 = scmp.lt.s32.totalorder %s3146_s23, %s3146_s23 }
  0x29   : > { %p2820_p9 = scmp.ne.s32.totalorder %s3146_s23, %s2819_s25  ;;  %p2828_p6 = scmp.lt.s32.totalorder %s2819_s25, %s2819_s25 }
  0x2b   : > { %p2822_p10 = pnand %p2820_p9, %p3167_p13  ;;  %p2829_p12 = por %p2828_p6, %p2827_p2 }
  0x2d   : > { %p2823_p1 = pneg %p2822_p10 }
  0x2f   : > { %p2830_p0 = pnand %p2829_p12, %p2823_p1 }
  0x31   : > { %2833 = shalt.err (!%p2830_p0)
}
  0x32   : > { %s3032_s27 = smov 64   ;;  %s3033_s28 = smov 4  }
  0x33   : > { %2517 = dma.hbm_to_vmem [thread:$0]  (!%p3153_p11), %s3476_s2, 6144, %s3146_s23, [#allocation8], %s3032_s27, %s3032_s27, %s3033_s28  }
  0x34   : > { %s2834_s22 = scalar_lea.hbm %s3455_s6, 2048 }
  0x35   : > { %p2835_p2 = scmp.ne.s32.totalorder %s3455_s6, %s2834_s22  ;;  %p2841_p10 = scmp.lt.u32.totalorder %s2834_s22, %s3455_s6 }
  0x37   : > { %p2837_p1 = pnand %p2835_p2, %p3167_p13 }
  0x39   : > { %p2838_p6 = pneg %p2837_p1 }
  0x3b   : > { %p2843_p3 = pnand %p2841_p10, %p2838_p6 }
  0x3d   : > { %2846 = shalt.err (!%p2843_p3)
}
  0x3e   : > { %s2847_s23 = scalar_lea.vmem %s3157_s26, 2048  ;;  %p2855_p12 = scmp.lt.s32.totalorder %s3157_s26, %s3157_s26 }
  0x3f   : > { %p2848_p5 = scmp.ne.s32.totalorder %s3157_s26, %s2847_s23  ;;  %p2856_p0 = scmp.lt.s32.totalorder %s2847_s23, %s2847_s23 }
  0x41   : > { %p2850_p7 = pnand %p2848_p5, %p3167_p13  ;;  %p2857_p2 = por %p2856_p0, %p2855_p12 }
  0x43   : > { %p2851_p9 = pneg %p2850_p7 }
  0x45   : > { %p2858_p1 = pnand %p2857_p2, %p2851_p9 }
  0x47   : > { %2861 = shalt.err (!%p2858_p1)
}
  0x48   : > { %s3034_s13 = smov 128   ;;  %s3035_s10 = smov 8  }
  0x49   : > { %2520 = dma.hbm_to_vmem [thread:$0]  (!%p3153_p11), %s3455_s6, 2048, %s3157_s26, [#allocation11], %s3034_s13, %s3034_s13, %s3035_s10  }
  0x4a   : > { %s3036_s28 = smov [#allocation12]   ;;  %s3212_s30 = sadd.s32 1, %s3028_s16  }
  0x4b   : > { %s328_s29 = sshll.u32 %s3036_s28, 4  ;;  %s2862_s22 = scalar_lea.hbm %s3456_s7, 12288  ;;  %s329_s29 = int_to_ptr.vmem [resolvable:$true] %s328_s29 }
  0x4c   : > { %p2863_p6 = scmp.ne.s32.totalorder %s3456_s7, %s2862_s22  ;;  %p2869_p5 = scmp.lt.u32.totalorder %s2862_s22, %s3456_s7 }
  0x4e   : > { %p2865_p10 = pnand %p2863_p6, %p3167_p13 }
  0x50   : > { %p2866_p3 = pneg %p2865_p10 }
  0x52   : > { %p2871_p7 = pnand %p2869_p5, %p2866_p3 }
  0x54   : > { %2874 = shalt.err (!%p2871_p7)
}
  0x55   : > { %s2875_s26 = scalar_lea.vmem %s329_s29, 12288  ;;  %p2883_p2 = scmp.lt.s32.totalorder %s329_s29, %s329_s29 }
  0x56   : > { %p2876_p9 = scmp.ne.s32.totalorder %s329_s29, %s2875_s26  ;;  %p2884_p1 = scmp.lt.s32.totalorder %s2875_s26, %s2875_s26 }
  0x58   : > { %p2878_p12 = pnand %p2876_p9, %p3167_p13  ;;  %p2885_p4 = por %p2884_p1, %p2883_p2 }
  0x5a   : > { %p2879_p0 = pneg %p2878_p12 }
  0x5c   : > { %p2886_p8 = pnand %p2885_p4, %p2879_p0 }
  0x5e   : > { %2889 = shalt.err (!%p2886_p8)
}
  0x5f   : > { %2523 = dma.hbm_to_vmem [thread:$0]  (!%p3153_p11), %s3456_s7, 12288, %s329_s29, [#allocation11], %s3034_s13, %s3034_s13, %s3035_s10  }
  0x60   : > { %s34_s2 = ssub.s32 %s3028_s16, %s3212_s30  ;;  %s37_s9 = sadd.s32 1, %s3024_s15 }
  0x61   : > { %p35_p4 = scmp.eq.s32.totalorder %s34_s2, 0  ;;  %p44_p8 = scmp.ne.s32.totalorder %s3024_s15, %s3020_s14 }
  0x62   : > { %p45_p13 = scmp.eq.s32.totalorder %s3028_s16, 0  ;;  %p2538_p6 = scmp.lt.s32.totalorder %s3028_s16, 2 }
  0x63   : > { %s3240_s24 = scalar_select %p35_p4, %s3024_s15, %s37_s9  }
  0x64   : > { %p46_p10 = por %p45_p13, %p44_p8  ;;  %p3478_p3 = scmp.eq.s32.totalorder %s3123_s17, 1 }
  0x65   : > { %s3249_s28 = sand.u32 1, %s3024_s15   ;;  %s2411_s13 = sshll.u32 %s3028_s16, 8 }
  0x66   : > { %p3244_p5 = por %p3478_p3, %p44_p8  ;;  %s2229_s10 = sshll.u32 %s3249_s28, 4 }
  0x67   : > { %s3480_s0 = sld [smem:[#allocation21_spill]]  ;;  %s352_s22 = scalar_lea.vmem [#allocation4], %s2229_s10 }
  0x68   : > { %s360_s25 = sshll.u32 %s352_s22, 4  ;;  %p3258_p11 = pnand %p2538_p6, %p46_p10  ;;  %s3262_s25 = int_to_ptr.vmem [resolvable:$true] %s360_s25 }
  0x69   : > { %s2232_s26 = sshll.u32 %s3249_s28, 5  ;;  %s349_s20 = scalar_lea.sflag [#allocation5], %s3249_s28 }
  0x6a   : > { %p2892_p9 = pneg %p3258_p11 }
  0x6d   : > { %s3256_s18 = scalar_lea.hbm %s3480_s0, %s2411_s13  ;;  %s2895_s13 = scalar_lea.hbm %s3480_s0, 512 }
  0x6e   : > { %s2890_s27 = scalar_lea.hbm %s3256_s18, 256  ;;  %p2896_p2 = scmp.lt.u32.totalorder %s3256_s18, %s3480_s0 }
  0x6f   : > { %p2891_p7 = scmp.ne.s32.totalorder %s3256_s18, %s2890_s27  ;;  %p2897_p1 = scmp.lt.u32.totalorder %s2895_s13, %s2890_s27 }
  0x70   : > { %p2899_p8 = scmp.lt.u32.totalorder %s2890_s27, %s3256_s18 }
  0x71   : > { %p2893_p12 = pnand %p2892_p9, %p2891_p7  ;;  %p2898_p4 = por %p2897_p1, %p2896_p2 }
  0x73   : > { %p2894_p0 = pneg %p2893_p12  ;;  %p2900_p13 = por %p2899_p8, %p2898_p4 }
  0x75   : > { %p2901_p6 = pnand %p2900_p13, %p2894_p0 }
  0x77   : > { %2904 = shalt.err (!%p2901_p6)
}
  0x78   : > { %s2905_s11 = scalar_lea.vmem %s3262_s25, 256  ;;  %s3037_s22 = smov [#allocation4]  }
  0x79   : > { %p2906_p10 = scmp.ne.s32.totalorder %s3262_s25, %s2905_s11  ;;  %s2910_s2 = sshll.u32 %s3037_s22, 4  ;;  %s2911_s2 = int_to_ptr.vmem [resolvable:$false] %s2910_s2 }
  0x7a   : > { %s2912_s9 = scalar_lea.vmem %s2911_s2, 512  ;;  %p2913_p12 = scmp.lt.s32.totalorder %s3262_s25, %s2911_s2 }
  0x7b   : > { %p2908_p3 = pnand %p2906_p10, %p2892_p9  ;;  %p2914_p2 = scmp.lt.s32.totalorder %s2912_s9, %s2905_s11 }
  0x7d   : > { %p2909_p7 = pneg %p2908_p3  ;;  %p2915_p1 = por %p2914_p2, %p2913_p12 }
  0x7f   : > { %p2916_p4 = pnand %p2915_p1, %p2909_p7 }
  0x81   : > { %2919 = shalt.err (!%p2916_p4)
}
  0x82   : > { %2527 = dma.hbm_to_vmem [thread:$0]  (!%p3258_p11), %s3256_s18, 256, %s3262_s25, %s349_s20  }
  0x83   : > { %s371_s27 = scalar_lea.vmem [#allocation7], %s2232_s26  ;;  %s367_s10 = sand.u32 1, %s3028_s16  }
  0x84   : > { %s378_s13 = sshll.u32 %s371_s27, 4  ;;  %s2412_s29 = sshll.u32 %s3028_s16, 9  ;;  %s3294_s13 = int_to_ptr.vmem [resolvable:$true] %s378_s13 }
  0x85   : > { %s3300_s2 = scalar_lea.hbm %s3450_s1, %s2412_s29  ;;  %s3302_s9 = scalar_lea.sflag [#allocation8], %s367_s10 }
  0x86   : > { %s2920_s0 = scalar_lea.hbm %s3300_s2, 512  ;;  %s2925_s25 = scalar_lea.hbm %s3450_s1, 1024 }
  0x87   : > { %p2921_p0 = scmp.ne.s32.totalorder %s3300_s2, %s2920_s0  ;;  %p2926_p6 = scmp.lt.u32.totalorder %s3300_s2, %s3450_s1 }
  0x88   : > { %p2927_p10 = scmp.lt.u32.totalorder %s2925_s25, %s2920_s0  ;;  %p2929_p7 = scmp.lt.u32.totalorder %s2920_s0, %s3300_s2 }
  0x89   : > { %p2923_p8 = pnand %p2921_p0, %p2892_p9 }
  0x8a   : > { %p2928_p3 = por %p2927_p10, %p2926_p6 }
  0x8b   : > { %p2924_p13 = pneg %p2923_p8 }
  0x8c   : > { %p2930_p12 = por %p2929_p7, %p2928_p3 }
  0x8e   : > { %p2931_p2 = pnand %p2930_p12, %p2924_p13 }
  0x90   : > { %2934 = shalt.err (!%p2931_p2)
}
  0x91   : > { %s2935_s27 = scalar_lea.vmem %s3294_s13, 512  ;;  %s3038_s10 = smov [#allocation7]  }
  0x92   : > { %p2936_p1 = scmp.ne.s32.totalorder %s3294_s13, %s2935_s27  ;;  %s2940_s29 = sshll.u32 %s3038_s10, 4  ;;  %s2941_s29 = int_to_ptr.vmem [resolvable:$false] %s2940_s29 }
  0x93   : > { %s2942_s11 = scalar_lea.vmem %s2941_s29, 1024  ;;  %p2943_p8 = scmp.lt.s32.totalorder %s3294_s13, %s2941_s29 }
  0x94   : > { %p2938_p4 = pnand %p2936_p1, %p2892_p9  ;;  %p2944_p6 = scmp.lt.s32.totalorder %s2942_s11, %s2935_s27 }
  0x96   : > { %p2939_p0 = pneg %p2938_p4  ;;  %p2945_p10 = por %p2944_p6, %p2943_p8 }
  0x98   : > { %p2946_p3 = pnand %p2945_p10, %p2939_p0 }
  0x9a   : > { %2949 = shalt.err (!%p2946_p3)
}
  0x9b   : > { %s3039_s0 = smov 256   ;;  %s3040_s22 = smov 16  }
  0x9c   : > { %2530 = dma.hbm_to_vmem [thread:$0]  (!%p3258_p11), %s3300_s2, 512, %s3294_s13, %s3302_s9, %s3039_s0, %s3039_s0, %s3040_s22  }
  0x9d   : > { %p3482_p9 = scmp.ne.s32.totalorder %s3474_s21, 0 }
  0x9e   : > { %s3331_s28 = sand.u32 (!%p3482_p9), 1, %s3020_s14   ;;  %p3483_p13 = scmp.ne.s32.totalorder (!%p3482_p9), %s3471_s19, 0 }
  0x9f   : > { %390 = sbr.rel (%p3482_p9) target bundleno = 1219 (0x4c3), region = 60  ;;  %s2236_s18 = sshll.u32 (!%p3482_p9), %s3331_s28, 4 }
  0xa0   : > { %s393_s25 = scalar_lea.sflag (!%p3482_p9), [#allocation5], %s3331_s28  ;;  %s3335_s26 = scalar_lea.vmem (!%p3482_p9), [#allocation4], %s2236_s18 }
  0xa6   : > { %2995 = dma.done.wait (%p3483_p13), %s393_s25, 256  }
  0xa7   : > { %2997 = vsyncadd (%p3483_p13), %s393_s25, 4294967040  ;;  %s401_s21 = sand.u32 1, %s3123_s17   ;;  %s2237_s23 = sshll.u32 %s3331_s28, 5 }
  0xa8   : > { %s402_s13 = scalar_lea.sflag [#allocation8], %s401_s21  ;;  %s3345_s2 = scalar_lea.vmem [#allocation7], %s2237_s23 }
  0xa9   : > { %2999 = dma.done.wait (%p3483_p13), %s402_s13, 512  }
  0xaa   : > { %3001 = vsyncadd (%p3483_p13), %s402_s13, 4294966784  ;;  %p3484_p11 = scmp.eq.s32.totalorder %s3123_s17, 0 }
  0xac   : > { %3003 = dma.done.wait (%p3484_p11), [#allocation8], 6144   ;;  %p3485_p7 = pmov %p3484_p11 }
  0xae   : > { %3005 = vsyncadd (%p3485_p7), [#allocation8], 4294961152  ;;  %p3486_p12 = pmov %p3485_p7 }
  0xaf   : > { %p3487_p2 = pmov %p3485_p7 }
  0xb0   : > { %3007 = dma.done.wait (%p3486_p12), [#allocation11], 14336  }
  0xb1   : > { %3009 = vsyncadd (%p3487_p2), [#allocation11], 4294952960  ;;  %v464_v0 = vlaneseq  ;;  %v3041_v1 = vmov 0.0   ;;  %v2589_v2 = vld [vmem:[#allocation9 + $0xc0] sm:$0xff]   ;;  %v2591_v4 = vld [vmem:[#allocation9 + $0xc8] sm:$0xff]   ;;  %vm3042_vm1 = vmmov 0  }
  0xb2   : > { %v2590_v3 = vld [vmem:[#allocation9 + $0x80] sm:$0xff]   ;;  %2414 = vmatprep.subr.bf16.mxu1 %v2589_v2  ;;  %v2592_v5 = vld [vmem:[#allocation9 + $0x88] sm:$0xff]   ;;  %v2593_v6 = vld [vmem:[#allocation9 + $0xd0] sm:$0xff]   ;;  %vm1055_vm2 = vcmask 1043456   ;;  %vm1051_vm3 = vcmask 64512   ;;  %vm1255_vm4 = vcmask 1040384  }
  0xb3   : > { %vm466_vm0 = vcmp.lt.s32.totalorder %v464_v0, 256  ;;  %2415 = vmatpush3.bf16.msra.mxu1 %v2590_v3  ;;  %v2594_v7 = vld [vmem:[#allocation9 + $0x90] sm:$0xff]   ;;  %v2595_v8 = vld [vmem:[#allocation9 + $0xd8] sm:$0xff]   ;;  %v2597_v10 = vld [vmem:[#allocation9 + $0xe0] sm:$0xff]   ;;  %vm1831_vm5 = vcmask 1046528   ;;  %s3488_s25 = sld [smem:[#allocation23_spill]] }
  0xb4   : > { %471 = vst.msk [vmem:[#allocation2 + $0x11] ss:$8 sm:$0x3] %vm466_vm0, %v3041_v1  ;;  %468 = vst.msk [vmem:[#allocation2] ss:$8 sm:$0x3] %vm466_vm0, %v3041_v1  ;;  %2416 = vmatprep.subr.bf16.mxu1 %v2591_v4 }
  0xb5   : > { %1246 = vst.msk [vmem:[#allocation3] ss:$8 sm:$0x3] %vm466_vm0, %v3041_v1  ;;  %1249 = vst.msk [vmem:[#allocation3 + $0x21] ss:$8 sm:$0x3] %vm466_vm0, %v3041_v1 }
  0xb6   : > { %v2596_v9 = vld [vmem:[#allocation9 + $0x98] sm:$0xff]   ;;  %v2598_v11 = vld [vmem:[#allocation9 + $0xa0] sm:$0xff]   ;;  %v2599_v12 = vld [vmem:[#allocation9 + $0xe8] sm:$0xff]   ;;  %vm1353_vm6 = vsmask.f32 7424  ;;  %s2413_s13 = sshll.u32 %s3123_s17, 9 }
  0xb7   : > { %2417 = vmatpush3.bf16.msra.mxu1 %v2592_v5  ;;  %v461_v13 = vld [vmem:[%s3335_s26 + $0x8] sm:$0xff]  ;;  %v2605_v15 = vld [vmem:[#allocation9 + $0x140] sm:$0xff]   ;;  %v2601_v20 = vld [vmem:[#allocation9 + $0xf0] sm:$0xff]   ;;  %s3489_s19 = sld [smem:[#allocation24_spill]]  ;;  %s2086_s17 = scalar_lea.sflag [#allocation6], %s3331_s28 }
  0xb8   : > { %2418 = vmatprep.subr.bf16.mxu1 %v2593_v6  ;;  %v476_v14 = vrot.slane %v461_v13, 7  ;;  %v460_v16 = vld [vmem:[%s3335_s26] sm:$0xff]  ;;  %v2600_v17 = vld [vmem:[#allocation9 + $0xa8] sm:$0xff]   ;;  %2458 = vmatprep.subr.bf16.mxu0 %v2605_v15  ;;  %v2603_v24 = vld [vmem:[#allocation9 + $0xf8] sm:$0xff]   ;;  %s458_s26 = scalar_lea.vmem [#allocation13], %s2237_s23  ;;  %s3044_s27 = smov [#allocation13]  }
  0xb9   : > { %v475_v18 = vrot.slane %v460_v16, 7  ;;  %v2607_v19 = vld [vmem:[#allocation9 + $0x100] sm:$0xff]   ;;  %v2609_v21 = vld [vmem:[#allocation9 + $0x148] sm:$0xff]   ;;  %v2602_v22 = vld [vmem:[#allocation9 + $0xb0] sm:$0xff]   ;;  %s2099_s21 = sshll.u32 %s458_s26, 4  ;;  %s2954_s10 = sshll.u32 %s3044_s27, 4  ;;  %s3400_s21 = int_to_ptr.vmem [resolvable:$true] %s2099_s21  ;;  %s2955_s10 = int_to_ptr.vmem [resolvable:$false] %s2954_s10 }
  0xba   : > { %480 = vst [vmem:[#allocation2 + $0x8] sm:$0xfe] %v476_v14  ;;  %482 = vst [vmem:[#allocation2 + $0x18] sm:$0x1] %v476_v14  ;;  %2459 = vmatpush3.bf16.msra.mxu0 %v2607_v19  ;;  %v2611_v23 = vld [vmem:[#allocation9 + $0x108] sm:$0xff]   ;;  %v2604_v25 = vld [vmem:[#allocation9 + $0xb8] sm:$0xff]   ;;  %p2957_p8 = scmp.lt.s32.totalorder %s3400_s21, %s2955_s10 }
  0xbb   : > { %2419 = vmatpush3.bf16.msra.mxu1 %v2594_v7  ;;  %479 = vst [vmem:[#allocation2] sm:$0xfe] %v475_v18  ;;  %481 = vst [vmem:[#allocation2 + $0x10] sm:$0x1] %v475_v18  ;;  %2460 = vmatprep.subr.bf16.mxu0 %v2609_v21  ;;  %v2613_v26 = vld [vmem:[#allocation9 + $0x150] sm:$0xff]   ;;  %v2606_v32 = vld [vmem:[#allocation9 + $0x40] sm:$0xff]  }
  0xbc   : > { %2420 = vmatprep.subr.bf16.mxu1 %v2595_v8  ;;  %v2615_v34 = vld [vmem:[#allocation9 + $0x110] sm:$0xff]   ;;  %v2617_v39 = vld [vmem:[#allocation9 + $0x158] sm:$0xff]   ;;  %v2608_v41 = vld [vmem:[#allocation9] sm:$0xff]   ;;  %s2950_s20 = scalar_lea.vmem %s3400_s21, 512  ;;  %s2956_s29 = scalar_lea.vmem %s2955_s10, 1024 }
  0xbd   : > { %v2619_v43 = vld [vmem:[#allocation9 + $0x118] sm:$0xff]   ;;  %v2610_v46 = vld [vmem:[#allocation9 + $0x48] sm:$0xff]   ;;  %v2621_v47 = vld [vmem:[#allocation9 + $0x160] sm:$0xff]   ;;  %s3405_s9 = scalar_lea.hbm %s3489_s19, %s2413_s13  ;;  %p2951_p1 = scmp.ne.s32.totalorder %s3400_s21, %s2950_s20 }
  0xbe   : > { %2461 = vmatpush3.bf16.msra.mxu0 %v2611_v23  ;;  %v2612_v48 = vld [vmem:[#allocation9 + $0x8] sm:$0xff]   ;;  %v2623_v49 = vld [vmem:[#allocation9 + $0x120] sm:$0xff]   ;;  %v2614_v50 = vld [vmem:[#allocation9 + $0x50] sm:$0xff]   ;;  %p2958_p6 = scmp.lt.s32.totalorder %s2956_s29, %s2950_s20 }
  0xbf   : > { %2421 = vmatpush3.bf16.msra.mxu1 %v2596_v9  ;;  %2462 = vmatprep.subr.bf16.mxu0 %v2613_v26  ;;  %v2625_v51 = vld [vmem:[#allocation9 + $0x168] sm:$0xff]   ;;  %v2616_v52 = vld [vmem:[#allocation9 + $0x10] sm:$0xff]   ;;  %v2618_v54 = vld [vmem:[#allocation9 + $0x58] sm:$0xff]   ;;  %p2952_p4 = pnand %p2951_p1, %p3244_p5 }
  0xc0   : > { %2422 = vmatprep.subr.bf16.mxu1 %v2597_v10  ;;  %v2627_v53 = vld [vmem:[#allocation9 + $0x128] sm:$0xff]   ;;  %v2629_v55 = vld [vmem:[#allocation9 + $0x170] sm:$0xff]   ;;  %v2620_v56 = vld [vmem:[#allocation9 + $0x18] sm:$0xff]   ;;  %p2959_p10 = por %p2958_p6, %p2957_p8 }
  0xc1   : > { %v520_v27 = vld [vmem:[#allocation2 + $0x8] sm:$0xfe]  ;;  %v522_v28 = vld [vmem:[#allocation2 + $0x18] sm:$0x1]  ;;  %v2631_v57 = vld [vmem:[#allocation9 + $0x130] sm:$0xff]   ;;  %p2953_p0 = pneg %p2952_p4 }
  0xc2   : > { %v524_v29 = vpack.c.bf16 %v522_v28, %v520_v27  ;;  %v519_v30 = vld [vmem:[#allocation2] sm:$0xfe]  ;;  %v521_v31 = vld [vmem:[#allocation2 + $0x10] sm:$0x1]  ;;  %2463 = vmatpush3.bf16.msra.mxu0 %v2615_v34  ;;  %v2633_v59 = vld [vmem:[#allocation9 + $0x178] sm:$0xff]  }
  0xc3   : > { %2423 = vmatpush3.bf16.msra.mxu1 %v2598_v11  ;;  %v523_v33 = vpack.c.bf16 %v521_v31, %v519_v30  ;;  %2464 = vmatprep.subr.bf16.mxu0 %v2617_v39  ;;  %v2622_v58 = vld [vmem:[#allocation9 + $0x60] sm:$0xff]   ;;  %v2635_v61 = vld [vmem:[#allocation9 + $0x138] sm:$0xff]   ;;  %v2626_v62 = vld [vmem:[#allocation9 + $0x68] sm:$0xff]   ;;  %p2960_p3 = pnand %p2959_p10, %p2953_p0 }
  0xc4   : > { %2424 = vmatprep.subr.bf16.mxu1 %v2599_v12  ;;  %v566_v35 = vshrl.u32 %v524_v29, 16  ;;  %v568_v36 = vshll.u32 %v524_v29, 16  ;;  %v2624_v60 = vld [vmem:[#allocation9 + $0x20] sm:$0xff]   ;;  %v847_v63 = vld [vmem:[#allocation2 + $0x8] sm:$0xfc]  ;;  %v2628_v3 = vld [vmem:[#allocation9 + $0x28] sm:$0xff]  }
  0xc5   : > { %v559_v37 = vshrl.u32 %v523_v33, 16  ;;  %v561_v38 = vshll.u32 %v523_v33, 16  ;;  %v849_v2 = vld [vmem:[#allocation2 + $0x18] sm:$0x3]  ;;  %v484_v5 = vld [vmem:[#allocation2 + $0x8] sm:$0xff]  ;;  %v2630_v8 = vld [vmem:[#allocation9 + $0x70] sm:$0xff]  }
  0xc6   : > { %v570_v40 = vrot.slane %v568_v36, 1  ;;  %2465 = vmatpush3.bf16.msra.mxu0 %v2619_v43  ;;  %v851_v4 = vpack.c.bf16 %v849_v2, %v847_v63  ;;  %v846_v6 = vld [vmem:[#allocation2] sm:$0xfc]  ;;  %v848_v7 = vld [vmem:[#allocation2 + $0x10] sm:$0x3]  ;;  %v486_v9 = vpack.c.bf16 %v484_v5, %v484_v5  ;;  %v2634_v14 = vld [vmem:[#allocation9 + $0x78] sm:$0xff]  }
  0xc7   : > { %2425 = vmatpush3.bf16.msra.mxu1 %v2600_v17  ;;  %v563_v42 = vrot.slane %v561_v38, 1  ;;  %2466 = vmatprep.subr.bf16.mxu0 %v2621_v47  ;;  %v850_v10 = vpack.c.bf16 %v848_v7, %v846_v6  ;;  %v2632_v13 = vld [vmem:[#allocation9 + $0x30] sm:$0xff]   ;;  %v2636_v15 = vld [vmem:[#allocation9 + $0x38] sm:$0xff]   ;;  %v2638_v43 = vld [vmem:[#allocation10] ss:$8 sps:$4 sm:$0xff]  }
  0xc8   : > { %2426 = vmatprep.subr.bf16.mxu1 %v2601_v20  ;;  %v571_v44 = vor.u32 %v570_v40, %v566_v35  ;;  %v888_v11 = vrot.slane %v851_v4, 1  ;;  %v483_v16 = vld [vmem:[#allocation2] sm:$0xff]  ;;  %v2640_v40 = vld [vmem:[#allocation10 + $0x4] ss:$8 sps:$4 sm:$0xff]   ;;  %v2644_v47 = vld [vmem:[#allocation10 + $0x20] ss:$8 sps:$4 sm:$0xff]  }
  0xc9   : > { %v564_v45 = vor.u32 %v563_v42, %v559_v37  ;;  %v887_v12 = vrot.slane %v850_v10, 1  ;;  %v485_v17 = vpack.c.bf16 %v483_v16, %v483_v16  ;;  %v2291_v35 = vld [vmem:[%s3453_s4] ss:$0 sm:$0xff]  ;;  %v2673_v2 = vld [vmem:[#allocation12 + $0x24] ss:$8 sps:$4 sm:$0xff]  }
  0xca   : > { %702 = vmatprep.mubr.bf16.mxu1 %v571_v44  ;;  %2467 = vmatpush3.bf16.msra.mxu0 %v2623_v49  ;;  %v2637_v42 = vld [vmem:[%s3454_s5] sm:$0xff]   ;;  %v2685_v6 = vld [vmem:[#allocation12 + $0x44] ss:$8 sps:$4 sm:$0xff]   ;;  %v2683_v7 = vld [vmem:[#allocation12 + $0x40] ss:$8 sps:$4 sm:$0xff]  }
  0xcb   : > { %2427 = vmatpush3.bf16.msra.mxu1 %v2602_v22  ;;  %2468 = vmatprep.subr.bf16.mxu0 %v2625_v51  ;;  %v2643_v44 = vld [vmem:[#allocation10 + $0x14] ss:$8 sps:$4 sm:$0xff]   ;;  %v2647_v49 = vld [vmem:[#allocation10 + $0x30] ss:$8 sps:$4 sm:$0xff]   ;;  %v2650_v51 = vld [vmem:[#allocation10 + $0x40] ss:$8 sps:$4 sm:$0xff]  }
  0xcc   : > { %2428 = vmatprep.subr.bf16.mxu1 %v2603_v24  ;;  %1019 = vmatprep.mubr.bf16.mxu0 %v888_v11  ;;  %v2665_v63 = vld [vmem:[#allocation12 + $0x10] ss:$8 sps:$4 sm:$0xff]   ;;  %v2679_v4 = vld [vmem:[#allocation12 + $0x34] ss:$8 sps:$4 sm:$0xff]   ;;  %v2697_v10 = vld [vmem:[#allocation12 + $0x64] ss:$8 sps:$4 sm:$0xff]  }
  0xcd   : > { %v2677_v5 = vld [vmem:[#allocation12 + $0x30] ss:$8 sps:$4 sm:$0xff]   ;;  %v2695_v11 = vld [vmem:[#allocation12 + $0x60] ss:$8 sps:$4 sm:$0xff]   ;;  %v2715_v16 = vld [vmem:[#allocation12 + $0x94] ss:$8 sps:$4 sm:$0xff]  }
  0xce   : > { %2469 = vmatpush3.bf16.msra.mxu0 %v2627_v53  ;;  %v2653_v53 = vld [vmem:[#allocation10 + $0x50] ss:$8 sps:$4 sm:$0xff]  }
  0xcf   : > { %2429 = vmatpush3.bf16.msra.mxu1 %v2604_v25  ;;  %2470 = vmatprep.subr.bf16.mxu0 %v2629_v55  ;;  %v2656_v55 = vld [vmem:[#allocation10 + $0x60] ss:$8 sps:$4 sm:$0xff]  }
  0xd0   : > { %2436 = vmatprep.subr.bf16.mxu1 %v2606_v32 }
  0xd2   : > { %703 = vmatmul.mubr.bf16.vlgmr.msra.gmra.mrb[0].mxu1 %v564_v45  ;;  %2471 = vmatpush3.bf16.msra.mxu0 %v2631_v57  ;;  %v2641_v45 = vld [vmem:[#allocation10 + $0x10] ss:$8 sps:$4 sm:$0xff]  }
  0xd3   : > { %2437 = vmatpush3.bf16.msra.mxu1 %v2608_v41  ;;  %2472 = vmatprep.subr.bf16.mxu0 %v2633_v59  ;;  %v2659_v57 = vld [vmem:[#allocation10 + $0x70] ss:$8 sps:$4 sm:$0xff]   ;;  %v2662_v59 = vld [vmem:[#allocation12] ss:$8 sps:$4 sm:$0xff]  }
  0xd4   : > { %2438 = vmatprep.subr.bf16.mxu1 %v2610_v46  ;;  %838 = vmatprep.mubr.bf16.mxu1 %v486_v9  ;;  %v2646_v46 = vld [vmem:[#allocation10 + $0x24] ss:$8 sps:$4 sm:$0xff]   ;;  %v2689_v9 = vld [vmem:[#allocation12 + $0x50] ss:$8 sps:$4 sm:$0xff]  }
  0xd6   : > { %2473 = vmatpush3.bf16.msra.mxu0 %v2635_v61  ;;  %v2667_v61 = vld [vmem:[#allocation12 + $0x14] ss:$8 sps:$4 sm:$0xff]  }
  0xd7   : > { %2439 = vmatpush3.bf16.msra.mxu1 %v2612_v48  ;;  %v2649_v48 = vld [vmem:[#allocation10 + $0x34] ss:$8 sps:$4 sm:$0xff]  }
  0xd8   : > { %2440 = vmatprep.subr.bf16.mxu1 %v2614_v50  ;;  %v2652_v50 = vld [vmem:[#allocation10 + $0x44] ss:$8 sps:$4 sm:$0xff]  }
  0xd9   : > { %1020 = vmatmul.mubr.bf16.vlgmr.msra.gmra.mrb[0].mxu0 %v887_v12  ;;  %v2703_v12 = vld [vmem:[#allocation12 + $0x74] ss:$8 sps:$4 sm:$0xff]  }
  0xdb   : > { %2441 = vmatpush3.bf16.msra.mxu1 %v2616_v52  ;;  %v2655_v52 = vld [vmem:[#allocation10 + $0x54] ss:$8 sps:$4 sm:$0xff]  }
  0xdc   : > { %2442 = vmatprep.subr.bf16.mxu1 %v2618_v54  ;;  %v2658_v54 = vld [vmem:[#allocation10 + $0x64] ss:$8 sps:$4 sm:$0xff]  }
  0xdf   : > { %2443 = vmatpush3.bf16.msra.mxu1 %v2620_v56  ;;  %v2661_v56 = vld [vmem:[#allocation10 + $0x74] ss:$8 sps:$4 sm:$0xff]  }
  0xe0   : > { %2444 = vmatprep.subr.bf16.mxu1 %v2622_v58  ;;  %v3043_v58 = vmov 0  }
  0xe3   : > { %2445 = vmatpush3.bf16.msra.mxu1 %v2624_v60  ;;  %v2664_v60 = vld [vmem:[#allocation12 + $0x4] ss:$8 sps:$4 sm:$0xff]  }
  0xe4   : > { %2446 = vmatprep.subr.bf16.mxu1 %v2626_v62  ;;  %v2670_v62 = vld [vmem:[#allocation12 + $0x104] ss:$8 sps:$4 sm:$0xff]   ;;  %1743 = vmatprep.subr.bf16.mxu0 %v2664_v60  ;;  %v2751_v60 = vld [vmem:[#allocation12 + $0xf4] ss:$8 sps:$4 sm:$0xff]  }
  0xe5   : > { %1744 = vmatpush1.bf16.msra.mxu0 %v2662_v59  ;;  %v2749_v59 = vld [vmem:[#allocation12 + $0xf0] ss:$8 sps:$4 sm:$0xff]  }
  0xe6   : > { %1745 = vmatprep.subr.bf16.mxu0 %v2667_v61  ;;  %v2754_v61 = vld [vmem:[#allocation12 + $0x1e4] ss:$8 sps:$4 sm:$0xff]  }
  0xe7   : > { %2447 = vmatpush3.bf16.msra.mxu1 %v2628_v3  ;;  %v2671_v3 = vld [vmem:[#allocation12 + $0x20] ss:$8 sps:$4 sm:$0xff]  }
  0xe8   : > { %2448 = vmatprep.subr.bf16.mxu1 %v2630_v8  ;;  %v2691_v8 = vld [vmem:[#allocation12 + $0x54] ss:$8 sps:$4 sm:$0xff]  }
  0xe9   : > { %1746 = vmatpush1.bf16.msra.mxu0 %v2665_v63  ;;  %v2757_v63 = vld [vmem:[#allocation12 + $0x204] ss:$8 sps:$4 sm:$0xff]  }
  0xea   : > { %1747 = vmatprep.subr.bf16.mxu0 %v2673_v2  ;;  %v2760_v2 = vld [vmem:[#allocation12 + $0x1f4] ss:$8 sps:$4 sm:$0xff]  }
  0xeb   : > { %2449 = vmatpush3.bf16.msra.mxu1 %v2632_v13  ;;  %v2701_v13 = vld [vmem:[#allocation12 + $0x70] ss:$8 sps:$4 sm:$0xff]  }
  0xec   : > { %2450 = vmatprep.subr.bf16.mxu1 %v2634_v14  ;;  %v2709_v14 = vld [vmem:[#allocation12 + $0x84] ss:$8 sps:$4 sm:$0xff]  }
  0xed   : > { %1748 = vmatpush1.bf16.msra.mxu0 %v2671_v3  ;;  %v2758_v3 = vld [vmem:[#allocation12 + $0x1f0] ss:$8 sps:$4 sm:$0xff]  }
  0xee   : > { %1749 = vmatprep.subr.bf16.mxu0 %v2679_v4  ;;  %v1117_v4 = vld [vmem:[%s3345_s2] sm:$0xff] }
  0xef   : > { %2451 = vmatpush3.bf16.msra.mxu1 %v2636_v15  ;;  %v2707_v15 = vld [vmem:[#allocation12 + $0x80] ss:$8 sps:$4 sm:$0xff]  }
  0xf0   : > { %2482 = vmatprep.subr.bf16.mxu1 %v3041_v1 }
  0xf1   : > { %1750 = vmatpush1.bf16.msra.mxu0 %v2677_v5  ;;  %v1118_v5 = vld [vmem:[%s3345_s2 + $0x8] sm:$0xff] }
  0xf2   : > { %839 = vmatmul.mubr.bf16.vlgmr.msra.gmra.mrb[4].mxu1 %v485_v17  ;;  %1751 = vmatprep.subr.bf16.mxu0 %v2685_v6  ;;  %v2713_v17 = vld [vmem:[#allocation12 + $0x90] ss:$8 sps:$4 sm:$0xff]  }
  0xf3   : > { %2484 = vmatprep.mubr.msk.bf16.mxu1 %vm3042_vm1, %v3041_v1  ;;  %v2290_v1 = vld [vmem:[%s3452_s3] ss:$0 sm:$0xff] }
  0xf5   : > { %1752 = vmatpush1.bf16.msra.mxu0 %v2683_v7  ;;  %v1119_v7 = vld [vmem:[%s3345_s2 + $0x10] sm:$0xff] }
  0xf6   : > { %1753 = vmatprep.subr.bf16.mxu0 %v2691_v8 }
  0xf9   : > { %1754 = vmatpush1.bf16.msra.mxu0 %v2689_v9 }
  0xfa   : > { %1755 = vmatprep.subr.bf16.mxu0 %v2697_v10  ;;  %v1120_v10 = vld [vmem:[%s3345_s2 + $0x18] sm:$0xff] }
  0xfd   : > { %1756 = vmatpush1.bf16.msra.mxu0 %v2695_v11 }
  0xfe   : > { %1757 = vmatprep.subr.bf16.mxu0 %v2703_v12 }
 0x101   : > { %1758 = vmatpush1.bf16.msra.mxu0 %v2701_v13 }
 0x102   : > { %1759 = vmatprep.subr.bf16.mxu0 %v2709_v14 }
 0x105   : > { %1760 = vmatpush1.bf16.msra.mxu0 %v2707_v15 }
 0x106   : > { %1761 = vmatprep.subr.bf16.mxu0 %v2715_v16 }
 0x109   : > { %1762 = vmatpush1.bf16.msra.mxu0 %v2713_v17 }
 0x1a5   : > { %v2430_v18 = vpop.f32.mrb[0].mxu1 }
 0x1a6   : > { %v2431_v19 = vpop.f32.mrb[1].mxu1 }
 0x1a7   : > { %v2432_v20 = vadd.f32 %v2431_v19, %v2430_v18  ;;  %v2433_v21 = vpop.f32.mrb[2].mxu1  ;;  %v2721_v18 = vld [vmem:[#allocation12 + $0xa4] ss:$8 sps:$4 sm:$0xff]   ;;  %v2719_v19 = vld [vmem:[#allocation12 + $0xa0] ss:$8 sps:$4 sm:$0xff]  }
 0x1a8   : > { %v2434_v22 = vpop.f32.mrb[3].mxu1  ;;  %1763 = vmatprep.subr.bf16.mxu0 %v2721_v18  ;;  %v2725_v21 = vld [vmem:[#allocation12 + $0xb0] ss:$8 sps:$4 sm:$0xff]  }
 0x1a9   : > { %1764 = vmatpush1.bf16.msra.mxu0 %v2719_v19 }
 0x1ac   : > { %v2474_v23 = vpop.f32.mrb[0].mxu0 }
 0x1ad   : > { %v2475_v24 = vpop.f32.mrb[1].mxu0 }
 0x1ae   : > { %v2476_v25 = vadd.f32 %v2475_v24, %v2474_v23  ;;  %v2477_v26 = vpop.f32.mrb[2].mxu0 }
 0x1af   : > { %v2478_v27 = vpop.f32.mrb[3].mxu0 }
 0x1c5   : > { %v2452_v28 = vpop.f32.mrb[4].mxu1 }
 0x1c6   : > { %v2453_v29 = vpop.f32.mrb[5].mxu1 }
 0x1c7   : > { %v2454_v30 = vadd.f32 %v2453_v29, %v2452_v28  ;;  %v2455_v31 = vpop.f32.mrb[6].mxu1  ;;  %v2676_v28 = vld [vmem:[#allocation12 + $0x114] ss:$8 sps:$4 sm:$0xff]   ;;  %v2674_v29 = vld [vmem:[#allocation12 + $0x110] ss:$8 sps:$4 sm:$0xff]  }
 0x1c8   : > { %v2456_v32 = vpop.f32.mrb[7].mxu1  ;;  %v2680_v31 = vld [vmem:[#allocation12 + $0x120] ss:$8 sps:$4 sm:$0xff]  }
 0x1c9   : > { %v841_v33 = vadd.f32 %v2454_v30, %v2432_v20  ;;  %v2727_v20 = vld [vmem:[#allocation12 + $0xb4] ss:$8 sps:$4 sm:$0xff]   ;;  %v2682_v30 = vld [vmem:[#allocation12 + $0x124] ss:$8 sps:$4 sm:$0xff]  }
 0x1ca   : > { %1765 = vmatprep.subr.bf16.mxu0 %v2727_v20  ;;  %v2688_v32 = vld [vmem:[#allocation12 + $0x134] ss:$8 sps:$4 sm:$0xff]  }
 0x1cb   : > { %v1027_v34 = vadd.f32 %v2476_v25, %v841_v33  ;;  %1766 = vmatpush1.bf16.msra.mxu0 %v2725_v21  ;;  %v2668_v25 = vld [vmem:[#allocation12 + $0x100] ss:$8 sps:$4 sm:$0xff]   ;;  %v2686_v33 = vld [vmem:[#allocation12 + $0x130] ss:$8 sps:$4 sm:$0xff]  }
 0x1cd   : > { %v1034_v36 = vmul.f32 %v2290_v1, %v1027_v34  ;;  %v2694_v1 = vld [vmem:[#allocation12 + $0x144] ss:$8 sps:$4 sm:$0xff]   ;;  %v2692_v34 = vld [vmem:[#allocation12 + $0x140] ss:$8 sps:$4 sm:$0xff]  }
 0x1cf   : > { %v1041_v37 = vadd.f32 %v2291_v35, %v1034_v36  ;;  %v2700_v35 = vld [vmem:[#allocation12 + $0x154] ss:$8 sps:$4 sm:$0xff]   ;;  %v2698_v36 = vld [vmem:[#allocation12 + $0x150] ss:$8 sps:$4 sm:$0xff]  }
 0x1d1   : > { %v1042_v38 = vmax.f32 %v1041_v37, 0.0  ;;  %v2706_v37 = vld [vmem:[#allocation12 + $0x164] ss:$8 sps:$4 sm:$0xff]  }
 0x1d3   : > { %v1045_v39 = vpack.c.bf16 %v1042_v38, %v1042_v38  ;;  %v2704_v38 = vld [vmem:[#allocation12 + $0x160] ss:$8 sps:$4 sm:$0xff]  }
 0x1d5   : > { %v1057_v41 = vsel %vm1055_vm2, %v1045_v39, 0  ;;  %v2712_v39 = vld [vmem:[#allocation12 + $0x174] ss:$8 sps:$4 sm:$0xff]  }
 0x1d6   : > { %2483 = vmatpush3.bf16.msra.mxu1 %v1057_v41  ;;  %v2718_v41 = vld [vmem:[#allocation12 + $0x184] ss:$8 sps:$4 sm:$0xff]  }
 0x1d7   : > { %1201 = vmatprep.subr.bf16.mxu1 %v2640_v40  ;;  %v2710_v40 = vld [vmem:[#allocation12 + $0x170] ss:$8 sps:$4 sm:$0xff]  }
 0x1d9   : > { %2485 = vmatmul.mubr.msk.bf16.vlgmr.msra.gmra.mrb[8].mxu1 %vm1051_vm3, %v2637_v42  ;;  %v2716_v42 = vld [vmem:[#allocation12 + $0x180] ss:$8 sps:$4 sm:$0xff]  }
 0x1da   : > { %1202 = vmatpush1.bf16.msra.mxu1 %v2638_v43  ;;  %1233 = vmatprep.mubr.bf16.mxu1 %v3043_v58  ;;  %v2724_v43 = vld [vmem:[#allocation12 + $0x194] ss:$8 sps:$4 sm:$0xff]  }
 0x1db   : > { %1203 = vmatprep.subr.bf16.mxu1 %v2643_v44  ;;  %v2722_v44 = vld [vmem:[#allocation12 + $0x190] ss:$8 sps:$4 sm:$0xff]   ;;  %v2748_v58 = vld [vmem:[#allocation12 + $0x1d4] ss:$8 sps:$4 sm:$0xff]  }
 0x1de   : > { %1204 = vmatpush1.bf16.msra.mxu1 %v2641_v45  ;;  %v2730_v45 = vld [vmem:[#allocation12 + $0x1a4] ss:$8 sps:$4 sm:$0xff]  }
 0x1df   : > { %1205 = vmatprep.subr.bf16.mxu1 %v2646_v46  ;;  %v2733_v46 = vld [vmem:[#allocation12 + $0xc4] ss:$8 sps:$4 sm:$0xff]  }
 0x1e0   : > { %1767 = vmatprep.subr.bf16.mxu0 %v2733_v46 }
 0x1e2   : > { %1206 = vmatpush1.bf16.msra.mxu1 %v2644_v47  ;;  %v2728_v47 = vld [vmem:[#allocation12 + $0x1a0] ss:$8 sps:$4 sm:$0xff]  }
 0x1e3   : > { %1207 = vmatprep.subr.bf16.mxu1 %v2649_v48  ;;  %v2731_v48 = vld [vmem:[#allocation12 + $0xc0] ss:$8 sps:$4 sm:$0xff]  }
 0x1e4   : > { %1768 = vmatpush1.bf16.msra.mxu0 %v2731_v48 }
 0x1e6   : > { %1208 = vmatpush1.bf16.msra.mxu1 %v2647_v49  ;;  %v2736_v49 = vld [vmem:[#allocation12 + $0x1b4] ss:$8 sps:$4 sm:$0xff]  }
 0x1e7   : > { %1209 = vmatprep.subr.bf16.mxu1 %v2652_v50  ;;  %v2739_v50 = vld [vmem:[#allocation12 + $0xd4] ss:$8 sps:$4 sm:$0xff]  }
 0x1e8   : > { %1769 = vmatprep.subr.bf16.mxu0 %v2739_v50  ;;  %v2766_v50 = vld [vmem:[#allocation12 + $0x224] ss:$8 sps:$4 sm:$0xff]  }
 0x1ea   : > { %1210 = vmatpush1.bf16.msra.mxu1 %v2650_v51  ;;  %v2734_v51 = vld [vmem:[#allocation12 + $0x1b0] ss:$8 sps:$4 sm:$0xff]  }
 0x1eb   : > { %1211 = vmatprep.subr.bf16.mxu1 %v2655_v52  ;;  %v2737_v52 = vld [vmem:[#allocation12 + $0xd0] ss:$8 sps:$4 sm:$0xff]  }
 0x1ec   : > { %1770 = vmatpush1.bf16.msra.mxu0 %v2737_v52 }
 0x1ee   : > { %1212 = vmatpush1.bf16.msra.mxu1 %v2653_v53  ;;  %v2742_v53 = vld [vmem:[#allocation12 + $0x1c4] ss:$8 sps:$4 sm:$0xff]  }
 0x1ef   : > { %1213 = vmatprep.subr.bf16.mxu1 %v2658_v54  ;;  %v2745_v54 = vld [vmem:[#allocation12 + $0xe4] ss:$8 sps:$4 sm:$0xff]  }
 0x1f0   : > { %1771 = vmatprep.subr.bf16.mxu0 %v2745_v54 }
 0x1f2   : > { %1214 = vmatpush1.bf16.msra.mxu1 %v2656_v55  ;;  %v2740_v55 = vld [vmem:[#allocation12 + $0x1c0] ss:$8 sps:$4 sm:$0xff]  }
 0x1f3   : > { %1215 = vmatprep.subr.bf16.mxu1 %v2661_v56  ;;  %v2743_v56 = vld [vmem:[#allocation12 + $0xe0] ss:$8 sps:$4 sm:$0xff]  }
 0x1f4   : > { %1772 = vmatpush1.bf16.msra.mxu0 %v2743_v56  ;;  %v2764_v56 = vld [vmem:[#allocation12 + $0x220] ss:$8 sps:$4 sm:$0xff]  }
 0x1f5   : > { %1773 = vmatprep.subr.bf16.mxu0 %v2751_v60  ;;  %v2767_v60 = vld [vmem:[#allocation12 + $0x230] ss:$8 sps:$4 sm:$0xff]  }
 0x1f6   : > { %1216 = vmatpush1.bf16.msra.mxu1 %v2659_v57  ;;  %v2746_v57 = vld [vmem:[#allocation12 + $0x1d0] ss:$8 sps:$4 sm:$0xff]  }
 0x1f7   : > { %1540 = vmatprep.subr.bf16.mxu1 %v2670_v62  ;;  %v2752_v62 = vld [vmem:[#allocation12 + $0x1e0] ss:$8 sps:$4 sm:$0xff]  }
 0x1f8   : > { %1774 = vmatpush1.bf16.msra.mxu0 %v2749_v59 }
 0x1f9   : > { %2000 = vmatprep.subr.bf16.mxu0 %v2757_v63  ;;  %v2775_v63 = vld [vmem:[#allocation12 + $0x254] ss:$8 sps:$4 sm:$0xff]  }
 0x2ac   : > { %v1093_v22 = vpop.f32.mrb[8].mxu1 }
 0x2ad   : > { %v2486_v23 = vpop.f32.mrb[9].mxu1 }
 0x2ae   : > { %v1096_v24 = vpop.f32.mrb[10].mxu1 }
 0x2af   : > { %v1100_v26 = vpack.c.bf16 %v1096_v24, %v1093_v22  ;;  %v2487_v27 = vpop.f32.mrb[11].mxu1 }
 0x2b1   : > { %1234 = vmatmul.mubr.bf16.vlgmr.msra.gmra.mrb[12].mxu1 %v1100_v26 }
 0x2b2   : > { %1541 = vmatpush1.bf16.msra.mxu1 %v2668_v25 }
 0x2b3   : > { %1542 = vmatprep.subr.bf16.mxu1 %v2676_v28 }
 0x2b6   : > { %1543 = vmatpush1.bf16.msra.mxu1 %v2674_v29 }
 0x2b7   : > { %1544 = vmatprep.subr.bf16.mxu1 %v2682_v30  ;;  %v2755_v30 = vld [vmem:[#allocation12 + $0x200] ss:$8 sps:$4 sm:$0xff]  }
 0x2ba   : > { %1545 = vmatpush1.bf16.msra.mxu1 %v2680_v31 }
 0x2bb   : > { %1546 = vmatprep.subr.bf16.mxu1 %v2688_v32  ;;  %v2763_v32 = vld [vmem:[#allocation12 + $0x214] ss:$8 sps:$4 sm:$0xff]  }
 0x2be   : > { %1547 = vmatpush1.bf16.msra.mxu1 %v2686_v33 }
 0x2bf   : > { %1548 = vmatprep.subr.bf16.mxu1 %v2694_v1 }
 0x2c2   : > { %1549 = vmatpush1.bf16.msra.mxu1 %v2692_v34 }
 0x2c3   : > { %1550 = vmatprep.subr.bf16.mxu1 %v2700_v35 }
 0x2c6   : > { %1551 = vmatpush1.bf16.msra.mxu1 %v2698_v36 }
 0x2c7   : > { %1552 = vmatprep.subr.bf16.mxu1 %v2706_v37 }
 0x2ca   : > { %1553 = vmatpush1.bf16.msra.mxu1 %v2704_v38 }
 0x2cb   : > { %1554 = vmatprep.subr.bf16.mxu1 %v2712_v39 }
 0x2ce   : > { %1555 = vmatpush1.bf16.msra.mxu1 %v2710_v40 }
 0x2cf   : > { %1556 = vmatprep.subr.bf16.mxu1 %v2718_v41 }
 0x2d2   : > { %1557 = vmatpush1.bf16.msra.mxu1 %v2716_v42 }
 0x2d3   : > { %1558 = vmatprep.subr.bf16.mxu1 %v2724_v43 }
 0x2d6   : > { %1559 = vmatpush1.bf16.msra.mxu1 %v2722_v44 }
 0x2d7   : > { %1560 = vmatprep.subr.bf16.mxu1 %v2730_v45  ;;  %v2761_v45 = vld [vmem:[#allocation12 + $0x210] ss:$8 sps:$4 sm:$0xff]  }
 0x2da   : > { %1561 = vmatpush1.bf16.msra.mxu1 %v2728_v47 }
 0x2db   : > { %1562 = vmatprep.subr.bf16.mxu1 %v2736_v49 }
 0x2de   : > { %1563 = vmatpush1.bf16.msra.mxu1 %v2734_v51 }
 0x2df   : > { %1564 = vmatprep.subr.bf16.mxu1 %v2742_v53 }
 0x2e2   : > { %1565 = vmatpush1.bf16.msra.mxu1 %v2740_v55 }
 0x2e3   : > { %1566 = vmatprep.subr.bf16.mxu1 %v2748_v58  ;;  %v2769_v58 = vld [vmem:[#allocation12 + $0x234] ss:$8 sps:$4 sm:$0xff]  }
 0x2e6   : > { %1567 = vmatpush1.bf16.msra.mxu1 %v2746_v57 }
 0x2e7   : > { %1568 = vmatprep.subr.bf16.mxu1 %v2754_v61  ;;  %v2772_v61 = vld [vmem:[#allocation12 + $0x244] ss:$8 sps:$4 sm:$0xff]  }
 0x2ea   : > { %1569 = vmatpush1.bf16.msra.mxu1 %v2752_v62  ;;  %v2770_v62 = vld [vmem:[#allocation12 + $0x240] ss:$8 sps:$4 sm:$0xff]  }
 0x2eb   : > { %1570 = vmatprep.subr.bf16.mxu1 %v2760_v2  ;;  %v2773_v2 = vld [vmem:[#allocation12 + $0x250] ss:$8 sps:$4 sm:$0xff]  }
 0x2ee   : > { %1571 = vmatpush1.bf16.msra.mxu1 %v2758_v3  ;;  %v2778_v3 = vld [vmem:[#allocation12 + $0x264] ss:$8 sps:$4 sm:$0xff]  }
 0x384   : > { %v1235_v6 = vpop.f32.mrb[12].mxu1 }
 0x385   : > { %v1236_v8 = vadd.f32 %v1235_v6, %v1117_v4  ;;  %v1237_v9 = vpop.f32.mrb[13].mxu1  ;;  %v2776_v4 = vld [vmem:[#allocation12 + $0x260] ss:$8 sps:$4 sm:$0xff]   ;;  %v2779_v6 = vld [vmem:[#allocation12 + $0x270] ss:$8 sps:$4 sm:$0xff]  }
 0x386   : > { %v1238_v11 = vadd.f32 %v1237_v9, %v1118_v5  ;;  %v1239_v12 = vpop.f32.mrb[14].mxu1  ;;  %v2781_v5 = vld [vmem:[#allocation12 + $0x274] ss:$8 sps:$4 sm:$0xff]  }
 0x387   : > { %v1256_v13 = vrot.slane %v1236_v8, 7  ;;  %v1240_v14 = vadd.f32 %v1239_v12, %v1119_v7  ;;  %v1241_v15 = vpop.f32.mrb[15].mxu1  ;;  %v2784_v7 = vld [vmem:[#allocation12 + $0x284] ss:$8 sps:$4 sm:$0xff]   ;;  %v2782_v8 = vld [vmem:[#allocation12 + $0x280] ss:$8 sps:$4 sm:$0xff]  }
 0x388   : > { %v1257_v16 = vrot.slane %v1238_v11, 7  ;;  %v1242_v17 = vadd.f32 %v1241_v15, %v1120_v10  ;;  %v2787_v9 = vld [vmem:[#allocation12 + $0x294] ss:$8 sps:$4 sm:$0xff]   ;;  %v2785_v10 = vld [vmem:[#allocation12 + $0x290] ss:$8 sps:$4 sm:$0xff]  }
 0x389   : > { %1268 = vst [vmem:[#allocation3] sm:$0xfe] %v1256_v13  ;;  %v1258_v18 = vrot.slane %v1240_v14, 7  ;;  %v2790_v11 = vld [vmem:[#allocation12 + $0x2a4] ss:$8 sps:$4 sm:$0xff]  }
 0x38a   : > { %1269 = vst [vmem:[#allocation3 + $0x8] sm:$0xfe] %v1257_v16  ;;  %v1260_v19 = vrot.slane %v1242_v17, 7  ;;  %v2788_v12 = vld [vmem:[#allocation12 + $0x2a0] ss:$8 sps:$4 sm:$0xff]  }
 0x38b   : > { %v3381_v20 = vsel %vm1255_vm4, %v1256_v13, %v1258_v18  ;;  %1272 = vst [vmem:[#allocation3 + $0x20] sm:$0x1] %v1258_v18  ;;  %v2793_v13 = vld [vmem:[#allocation12 + $0x2b4] ss:$8 sps:$4 sm:$0xff]   ;;  %v2791_v14 = vld [vmem:[#allocation12 + $0x2b0] ss:$8 sps:$4 sm:$0xff]  }
 0x38c   : > { %v1261_v21 = vsel %vm1255_vm4, %v1257_v16, %v1260_v19  ;;  %1273 = vst [vmem:[#allocation3 + $0x28] sm:$0x1] %v1260_v19  ;;  %v2796_v15 = vld [vmem:[#allocation12 + $0x2c4] ss:$8 sps:$4 sm:$0xff]   ;;  %v2794_v16 = vld [vmem:[#allocation12 + $0x2c0] ss:$8 sps:$4 sm:$0xff]  }
 0x38d   : > { %v2799_v17 = vld [vmem:[#allocation12 + $0x2d4] ss:$8 sps:$4 sm:$0xff]   ;;  %v2797_v18 = vld [vmem:[#allocation12 + $0x2d0] ss:$8 sps:$4 sm:$0xff]   ;;  %v2802_v19 = vld [vmem:[#allocation12 + $0x2e4] ss:$8 sps:$4 sm:$0xff]  }
 0x390   : > { %v1274_v22 = vld [vmem:[#allocation3] sm:$0xff] }
 0x391   : > { %v1312_v23 = vld [vmem:[#allocation3] sm:$0xfe]  ;;  %v1275_v24 = vld [vmem:[#allocation3 + $0x8] sm:$0xff]  ;;  %v1278_v1 = vpack.c.bf16 %v3381_v20, %v1274_v22  ;;  %v2800_v22 = vld [vmem:[#allocation12 + $0x2e0] ss:$8 sps:$4 sm:$0xff]  }
 0x392   : > { %v1313_v25 = vld [vmem:[#allocation3 + $0x8] sm:$0xfe]  ;;  %v1316_v27 = vpack.c.bf16 %v3381_v20, %v1312_v23  ;;  %v1279_v28 = vpack.c.bf16 %v1261_v21, %v1275_v24  ;;  %v1314_v33 = vld [vmem:[#allocation3 + $0x20] sm:$0x1]  ;;  %v1786_v24 = vld [vmem:[#allocation3] sm:$0xfc] }
 0x393   : > { %v1787_v26 = vld [vmem:[#allocation3 + $0x8] sm:$0xfc]  ;;  %v1317_v29 = vpack.c.bf16 %v1261_v21, %v1313_v25  ;;  %v1789_v34 = vld [vmem:[#allocation3 + $0x28] sm:$0x3]  ;;  %v1318_v36 = vpack.c.bf16 %v1314_v33, %v1314_v33 }
 0x394   : > { %v1791_v31 = vpack.c.bf16 %v1261_v21, %v1787_v26  ;;  %v1315_v35 = vld [vmem:[#allocation3 + $0x28] sm:$0x1]  ;;  %v1357_v37 = vshll.u32 %v1316_v27, 16  ;;  %1775 = vmatprep.mubr.bf16.mxu0 %v1279_v28  ;;  %v1793_v38 = vpack.c.bf16 %v1789_v34, %v1789_v34  ;;  %v1355_v47 = vshrl.u32 %v1316_v27, 16  ;;  %v1788_v21 = vld [vmem:[#allocation3 + $0x20] sm:$0x3] }
 0x395   : > { %v1319_v39 = vpack.c.bf16 %v1315_v35, %v1315_v35  ;;  %1776 = vmatmul.mubr.bf16.vlgmr.msra.gmra.mrb[4].mxu0 %v1278_v1  ;;  %v1369_v40 = vshll.u32 %v1317_v29, 16  ;;  %v1362_v42 = vshll.u32 %v1318_v36, 16  ;;  %v1367_v48 = vshrl.u32 %v1317_v29, 16  ;;  %v2805_v23 = vld [vmem:[#allocation12 + $0x2f4] ss:$8 sps:$4 sm:$0xff]  }
 0x396   : > { %v1359_v41 = vrot.slane %v1357_v37, 1  ;;  %2001 = vmatpush1.bf16.msra.mxu0 %v2755_v30  ;;  %v1835_v43 = vrot.slane %v1791_v31, 1  ;;  %v1836_v44 = vrot.slane %v1793_v38, 1  ;;  %v1792_v25 = vpack.c.bf16 %v1788_v21, %v1788_v21  ;;  %v2803_v26 = vld [vmem:[#allocation12 + $0x2f0] ss:$8 sps:$4 sm:$0xff]  }
 0x397   : > { %v1374_v46 = vshll.u32 %v1319_v39, 16  ;;  %2002 = vmatprep.subr.bf16.mxu0 %v2763_v32  ;;  %v1371_v49 = vrot.slane %v1369_v40, 1  ;;  %v1364_v54 = vrot.slane %v1362_v42, 1  ;;  %v1790_v27 = vpack.c.bf16 %v3381_v20, %v1786_v24  ;;  %v1244_v36 = vld [vmem:[%s3457_s8] sm:$0x3] }
 0x398   : > { %v1837_v51 = vsel %vm1831_vm5, %v1835_v43, %v1836_v44  ;;  %v1360_v53 = vor.u32 %v1359_v41, %v1355_v47  ;;  %v1833_v28 = vrot.slane %v1792_v25, 1  ;;  %v2049_v34 = vshrl.u32 %v464_v0, 7  ;;  %v1245_v20 = vld [vmem:[%s3488_s25] sm:$0x3] }
 0x399   : > { %v1376_v52 = vrot.slane %v1374_v46, 1  ;;  %2032 = vmatprep.mubr.bf16.mxu0 %v1837_v51  ;;  %v1372_v55 = vor.u32 %v1371_v49, %v1367_v48  ;;  %v1832_v29 = vrot.slane %v1790_v27, 1 }
 0x39a   : > { %2003 = vmatpush1.bf16.msra.mxu0 %v2761_v45  ;;  %v1365_v59 = vsel %vm1353_vm6, %v1360_v53, %v1364_v54  ;;  %v2050_v35 = vsub.s32 0, %v2049_v34  ;;  %v2054_v37 = vsub.s32 1, %v2049_v34 }
 0x39b   : > { %v1377_v57 = vsel %vm1353_vm6, %v1372_v55, %v1376_v52  ;;  %2004 = vmatprep.subr.bf16.mxu0 %v2766_v50  ;;  %v1834_v30 = vsel %vm1831_vm5, %v1832_v29, %v1833_v28 }
 0x39c   : > { %1572 = vmatprep.mubr.bf16.mxu1 %v1377_v57  ;;  %v2051_v38 = vrot.slane %v1244_v36, %v2050_v35  ;;  %v2055_v40 = vrot.slane %v1244_v36, %v2054_v37  ;;  %v2066_v42 = vrot.slane %v1245_v20, %v2050_v35  ;;  %v2070_v0 = vrot.slane %v1245_v20, %v2054_v37 }
 0x39d   : > { %1573 = vmatmul.mubr.bf16.vlgmr.msra.gmra.mrb[16].mxu1 %v1365_v59 }
 0x39e   : > { %2005 = vmatpush1.bf16.msra.mxu0 %v2764_v56 }
 0x39f   : > { %2006 = vmatprep.subr.bf16.mxu0 %v2769_v58 }
 0x3a2   : > { %2007 = vmatpush1.bf16.msra.mxu0 %v2767_v60 }
 0x3a3   : > { %2008 = vmatprep.subr.bf16.mxu0 %v2772_v61 }
 0x3a6   : > { %2009 = vmatpush1.bf16.msra.mxu0 %v2770_v62 }
 0x3a7   : > { %2010 = vmatprep.subr.bf16.mxu0 %v2775_v63 }
 0x3aa   : > { %2011 = vmatpush1.bf16.msra.mxu0 %v2773_v2 }
 0x3ab   : > { %2012 = vmatprep.subr.bf16.mxu0 %v2778_v3 }
 0x3ae   : > { %2013 = vmatpush1.bf16.msra.mxu0 %v2776_v4 }
 0x3af   : > { %2014 = vmatprep.subr.bf16.mxu0 %v2781_v5 }
 0x3b2   : > { %2015 = vmatpush1.bf16.msra.mxu0 %v2779_v6 }
 0x3b3   : > { %2016 = vmatprep.subr.bf16.mxu0 %v2784_v7 }
 0x3b6   : > { %2017 = vmatpush1.bf16.msra.mxu0 %v2782_v8 }
 0x3b7   : > { %2018 = vmatprep.subr.bf16.mxu0 %v2787_v9 }
 0x3ba   : > { %2019 = vmatpush1.bf16.msra.mxu0 %v2785_v10 }
 0x3bb   : > { %2020 = vmatprep.subr.bf16.mxu0 %v2790_v11 }
 0x3be   : > { %2021 = vmatpush1.bf16.msra.mxu0 %v2788_v12 }
 0x3bf   : > { %2022 = vmatprep.subr.bf16.mxu0 %v2793_v13 }
 0x3c2   : > { %2023 = vmatpush1.bf16.msra.mxu0 %v2791_v14 }
 0x3c3   : > { %2024 = vmatprep.subr.bf16.mxu0 %v2796_v15 }
 0x3c6   : > { %2025 = vmatpush1.bf16.msra.mxu0 %v2794_v16 }
 0x3c7   : > { %2026 = vmatprep.subr.bf16.mxu0 %v2799_v17 }
 0x3ca   : > { %2027 = vmatpush1.bf16.msra.mxu0 %v2797_v18 }
 0x3cb   : > { %2028 = vmatprep.subr.bf16.mxu0 %v2802_v19 }
 0x3ce   : > { %2029 = vmatpush1.bf16.msra.mxu0 %v2800_v22 }
 0x3cf   : > { %2030 = vmatprep.subr.bf16.mxu0 %v2805_v23 }
 0x3d2   : > { %2031 = vmatpush1.bf16.msra.mxu0 %v2803_v26 }
 0x3d5   : > { %2033 = vmatmul.mubr.bf16.vlgmr.msra.gmra.mrb[4].mxu0 %v1834_v30 }
 0x470   : > { %v1574_v31 = vpop.f32.mrb[16].mxu1 }
 0x471   : > { %v1576_v32 = vpop.f32.mrb[17].mxu1 }
 0x472   : > { %v1578_v33 = vpop.f32.mrb[18].mxu1 }
 0x473   : > { %v1580_v1 = vpop.f32.mrb[19].mxu1 }
 0x4a8   : > { %v2034_v39 = vpop.f32.mrb[4].mxu0 }
 0x4a9   : > { %v2488_v41 = vadd.f32 %v2034_v39, %v1574_v31  ;;  %v2036_v43 = vpop.f32.mrb[5].mxu0 }
 0x4aa   : > { %v2489_v44 = vadd.f32 %v2036_v43, %v1576_v32  ;;  %v2038_v45 = vpop.f32.mrb[6].mxu0 }
 0x4ab   : > { %v2058_v46 = vmul.f32 %v2488_v41, %v2051_v38  ;;  %v2490_v47 = vadd.f32 %v2038_v45, %v1578_v33  ;;  %v2040_v48 = vpop.f32.mrb[7].mxu0 }
 0x4ac   : > { %v2059_v49 = vmul.f32 %v2489_v44, %v2055_v40  ;;  %v2491_v50 = vadd.f32 %v2040_v48, %v1580_v1 }
 0x4ad   : > { %v2073_v51 = vadd.f32 %v2066_v42, %v2058_v46  ;;  %v2060_v52 = vmul.f32 %v2490_v47, %v2051_v38 }
 0x4ae   : > { %v2074_v53 = vadd.f32 %v2070_v0, %v2059_v49  ;;  %v2061_v54 = vmul.f32 %v2491_v50, %v2055_v40 }
 0x4af   : > { %v2077_v55 = vmax.f32 %v2073_v51, 0.0  ;;  %v2075_v56 = vadd.f32 %v2066_v42, %v2060_v52 }
 0x4b0   : > { %v2078_v57 = vmax.f32 %v2074_v53, 0.0  ;;  %v2076_v58 = vadd.f32 %v2070_v0, %v2061_v54 }
 0x4b1   : > { %2081 = vst [vmem:[%s458_s26] sm:$0xff] %v2077_v55  ;;  %v2079_v59 = vmax.f32 %v2075_v56, 0.0 }
 0x4b2   : > { %2082 = vst [vmem:[%s458_s26 + $0x8] sm:$0xff] %v2078_v57  ;;  %v2080_v60 = vmax.f32 %v2076_v58, 0.0 }
 0x4b3   : > { %2083 = vst [vmem:[%s458_s26 + $0x10] sm:$0xff] %v2079_v59 }
 0x4b4   : > { %2084 = vst [vmem:[%s458_s26 + $0x18] sm:$0xff] %v2080_v60 }
 0x4b5   : > { %2963 = shalt.err (!%p2960_p3)
}
 0x4b6   : > { %s2964_s11 = scalar_lea.hbm %s3405_s9, 512  ;;  %s2968_s18 = scalar_lea.hbm %s3489_s19, 1024 }
 0x4b7   : > { %p2965_p9 = scmp.ne.s32.totalorder %s3405_s9, %s2964_s11  ;;  %p2969_p7 = scmp.lt.u32.totalorder %s3405_s9, %s3489_s19 }
 0x4b8   : > { %p2970_p12 = scmp.lt.u32.totalorder %s2968_s18, %s2964_s11  ;;  %p2972_p1 = scmp.lt.u32.totalorder %s2964_s11, %s3405_s9 }
 0x4b9   : > { %p2966_p13 = pnand %p2965_p9, %p3244_p5 }
 0x4ba   : > { %p2971_p2 = por %p2970_p12, %p2969_p7 }
 0x4bb   : > { %p2967_p11 = pneg %p2966_p13 }
 0x4bc   : > { %p2973_p4 = por %p2972_p1, %p2971_p2 }
 0x4be   : > { %p2974_p0 = pnand %p2973_p4, %p2967_p11 }
 0x4c0   : > { %2977 = shalt.err (!%p2974_p0)
}
 0x4c1   : > { %s3045_s13 = smov 256   ;;  %s3046_s2 = smov 16  }
 0x4c2   : > { %2512 = dma.vmem_to_hbm [thread:$0]  (%p3244_p5), %s3400_s21, 512, %s3405_s9, %s2086_s17, %s3045_s13, %s3045_s13, %s3046_s2  }
 0x4c3 PF: > { %s3490_s23 = sld [smem:[#allocation19_spill]]  ;;  %s3491_s20 = sld [smem:[#allocation20_spill]] }
 0x4c4   : > { %p3493_p6 = scmp.ge.s32.totalorder %s3028_s16, 2 }
 0x4c9   : > { %s2114_s27 = sand.u32 1, %s3490_s23   ;;  %p3492_p8 = scmp.ne.s32.totalorder %s3491_s20, 0 }
 0x4ca   : > { %s2115_s10 = scalar_lea.sflag [#allocation6], %s2114_s27 }
 0x4cb   : > { %p2532_p10 = pnand %p3493_p6, %p3492_p8 }
 0x4cd   : > { %3011 = dma.done.wait (!%p2532_p10), %s2115_s10, 512  }
 0x4ce   : > { %3013 = vsyncadd (!%p2532_p10), %s2115_s10, 4294966784  ;;  %p27_p3 = scmp.ge.s32.totalorder %s3212_s30, 4   ;;  %s3494_s13 = smov %s3020_s14 }
 0x4cf   : > { %s3495_s14 = smov %s3024_s15  ;;  %s3496_s15 = smov %s3240_s24 }
 0x4d0   : > { %s3497_s16 = smov %s3212_s30  ;;  %29 = sbr.rel (!%p27_p3) target bundleno = 13 (0xd), region = 136 }
 0x4d7   :  { %2120 = vsyncpa [#allocation5], 1 }
 0x4d8   :  { %2122 = vsyncpa [#allocation5 + $0x1], 1 }
 0x4d9   :  { %2123 = vsyncpa [#allocation8], 1 }
 0x4da   :  { %2125 = vsyncpa [#allocation8 + $0x1], 1 }
 0x4db   :  { %2126 = vsyncpa [#allocation11], 1 }
 0x4dc   :  { %2127 = vsyncpa [#allocation6], 1 }
 0x4dd   :  { %2129 = vsyncpa [#allocation6 + $0x1], 1 }

</bundles_post_ra>
